<compile_context>
chip_gen: v7x
topology: tpu7x:2x2x1
jax: 0.10.0
libtpu: 0.0.40
codegen_flags: <defaults>
</compile_context>

<pallas_src>
import jax
import jax.numpy as jnp
from jax.experimental import pallas as pl
from jax.experimental.pallas import tpu as pltpu

BN_EPS = 1e-5
K_SIZE = 3

# Set to jnp.bfloat16 on v6e/v7x for the MXU-native path (halves activation DMA);
# accumulation stays f32 via preferred_element_type. f32 default keeps exact
# parity with the PyTorch fp32 forward (also the right choice on v5e).
MXU_DTYPE = jnp.float32


# ---------------------------------------------------------------------------
# Pallas kernels: fused tap-matmul conv + (BN-folded) bias + ReLU
# ---------------------------------------------------------------------------
def _enc_block_kernel(xe_ref, xo_ref, w_ref, b_ref, o_ref):
    # Conv1d(k=3, s=2, p=1): out[l] = sum_k x_pad[2l+k] @ W_k
    # xe_ref: (L_out + 1, C_in)  even-phase rows of the padded input
    # xo_ref: (L_out,     C_in)  odd-phase rows (kernel-centre taps)
    # w_ref : (3, C_in, C_out)   BN-folded conv weight, one matrix per tap
    # b_ref : (1, C_out)         BN-folded bias
    # o_ref : (L_out, C_out)
    l_out = o_ref.shape[0]
    acc = jnp.dot(xe_ref[0:l_out, :], w_ref[0],
                  preferred_element_type=jnp.float32)
    acc = acc + jnp.dot(xo_ref[...], w_ref[1],
                        preferred_element_type=jnp.float32)
    acc = acc + jnp.dot(xe_ref[1:l_out + 1, :], w_ref[2],
                        preferred_element_type=jnp.float32)
    acc = acc + b_ref[...]
    o_ref[...] = jnp.maximum(acc, 0.0).astype(o_ref.dtype)


def _dec_block_kernel(x_ref, w_ref, b_ref, o_ref):
    # ConvTranspose1d(k=3, s=2, p=1, output_padding=1), phase-split:
    #   out[2j]   = x[j]   @ w[:,:,1] + b
    #   out[2j+1] = x[j]   @ w[:,:,2] + x[j+1] @ w[:,:,0] + b   (x[L] := 0)
    # x_ref: (L + 1, C_in)      rows 0..L-1 = activations, row L = zero pad
    # w_ref: (3, C_in, C_out)   [0]=w[:,:,1] (even), [1]=w[:,:,2], [2]=w[:,:,0]
    # b_ref: (1, C_out)
    # o_ref: (L, 2*C_out)       cols [0:C_out] = even outputs, [C_out:] = odd
    l = o_ref.shape[0]
    c_out = b_ref.shape[1]
    x_cur = x_ref[0:l, :]
    x_nxt = x_ref[1:l + 1, :]
    even = jnp.dot(x_cur, w_ref[0], preferred_element_type=jnp.float32) + b_ref[...]
    odd = (jnp.dot(x_cur, w_ref[1], preferred_element_type=jnp.float32)
           + jnp.dot(x_nxt, w_ref[2], preferred_element_type=jnp.float32)
           + b_ref[...])
    o_ref[:, 0:c_out] = jnp.maximum(even, 0.0).astype(o_ref.dtype)
    o_ref[:, c_out:2 * c_out] = jnp.maximum(odd, 0.0).astype(o_ref.dtype)


def _conv_cost(n, l, c_in, c_out):
    flops = 2 * K_SIZE * n * l * c_in * c_out
    bytes_acc = 4 * (n * (l + 1) * c_in + K_SIZE * c_in * c_out + c_out
                     + n * l * c_out)
    return pl.CostEstimate(flops=flops, transcendentals=0,
                           bytes_accessed=bytes_acc)


# ---------------------------------------------------------------------------
# Block wrappers (channels-last activations; only cheap slicing in XLA)
# ---------------------------------------------------------------------------
def cnn_block_1d(x_nlc, folded):
    # Conv1d(c_in, c_out, k=3, s=2, p=1) + BN(eval) + ReLU; (N, L, C) in/out.
    w_taps, b_eff = folded
    n, length, c_in = x_nlc.shape
    assert length % 2 == 0, "stride-2 block expects even length"
    l_out = length // 2
    c_out = w_taps.shape[-1]
    x = x_nlc.astype(MXU_DTYPE)
    # Phase split of the pad-1 input:
    #   even rows of x_pad = [0, x[1], x[3], ...], odd rows = [x[0], x[2], ...]
    xe = jnp.concatenate(
        [jnp.zeros((n, 1, c_in), x.dtype), x[:, 1::2, :]], axis=1)  # (n, l_out+1, c_in)
    xo = x[:, 0::2, :]                                              # (n, l_out, c_in)
    return pl.pallas_call(
        _enc_block_kernel,
        out_shape=jax.ShapeDtypeStruct((n, l_out, c_out), jnp.float32),
        grid=(n,),
        in_specs=[
            pl.BlockSpec((None, l_out + 1, c_in), lambda b: (b, 0, 0)),
            pl.BlockSpec((None, l_out, c_in), lambda b: (b, 0, 0)),
            pl.BlockSpec((K_SIZE, c_in, c_out), lambda b: (0, 0, 0)),
            pl.BlockSpec((1, c_out), lambda b: (0, 0)),
        ],
        out_specs=pl.BlockSpec((None, l_out, c_out), lambda b: (b, 0, 0)),
        compiler_params=pltpu.CompilerParams(dimension_semantics=("parallel",)),
        cost_estimate=_conv_cost(n, l_out, c_in, c_out),
    )(xe, xo, w_taps, b_eff)


def cnn_block_inv_1d(x_nlc, folded):
    # ConvTranspose1d(c_in, c_out, k=3, s=2, p=1, op=1) + BN(eval) + ReLU; NLC in/out.
    w_taps, b_eff = folded
    n, l_in, c_in = x_nlc.shape
    c_out = w_taps.shape[-1]
    x_ext = jnp.pad(x_nlc.astype(MXU_DTYPE), ((0, 0), (0, 1), (0, 0)))  # (n, l_in+1, c_in)
    y = pl.pallas_call(
        _dec_block_kernel,
        out_shape=jax.ShapeDtypeStruct((n, l_in, 2 * c_out), jnp.float32),
        grid=(n,),
        in_specs=[
            pl.BlockSpec((None, l_in + 1, c_in), lambda b: (b, 0, 0)),
            pl.BlockSpec((K_SIZE, c_in, c_out), lambda b: (0, 0, 0)),
            pl.BlockSpec((1, c_out), lambda b: (0, 0)),
        ],
        out_specs=pl.BlockSpec((None, l_in, 2 * c_out), lambda b: (b, 0, 0)),
        compiler_params=pltpu.CompilerParams(dimension_semantics=("parallel",)),
        cost_estimate=_conv_cost(n, l_in, c_in, c_out),
    )(x_ext, w_taps, b_eff)
    # Row-major reshape interleaves the even/odd column halves into
    # output positions 2j / 2j+1 for free.
    return y.reshape(n, 2 * l_in, c_out)


# ---------------------------------------------------------------------------
# Parameters: synthetic PyTorch-like init, then BN/bias fold (done once)
# ---------------------------------------------------------------------------
def _init_block_raw(key, c_in, c_out, transpose=False):
    kw, kb = jax.random.split(key)
    fan_in = c_in * K_SIZE
    bound = 1.0 / float(fan_in) ** 0.5
    w_shape = (c_in, c_out, K_SIZE) if transpose else (c_out, c_in, K_SIZE)
    w = jax.random.uniform(kw, w_shape, jnp.float32, -bound, bound)
    b = jax.random.uniform(kb, (c_out,), jnp.float32, -bound, bound)
    # BatchNorm1d(c_out), eval mode with fresh stats.
    gamma = jnp.ones((c_out,), jnp.float32)
    beta = jnp.zeros((c_out,), jnp.float32)
    mean = jnp.zeros((c_out,), jnp.float32)
    var = jnp.ones((c_out,), jnp.float32)
    return w, b, gamma, beta, mean, var


def _fold_enc(raw):
    w, b, gamma, beta, mean, var = raw                      # w: (c_out, c_in, K)
    scale = gamma / jnp.sqrt(var + BN_EPS)                  # (c_out,)
    w_taps = jnp.transpose(w, (2, 1, 0)) * scale            # (K, c_in, c_out)
    b_eff = (b * scale + (beta - mean * scale)).reshape(1, -1)
    return w_taps.astype(MXU_DTYPE), b_eff.astype(jnp.float32)


def _fold_dec(raw):
    w, b, gamma, beta, mean, var = raw                      # w: (c_in, c_out, K)
    scale = gamma / jnp.sqrt(var + BN_EPS)
    # tap order: even outputs (k=1), odd from x[j] (k=2), odd from x[j+1] (k=0)
    w_taps = jnp.stack([w[:, :, 1], w[:, :, 2], w[:, :, 0]], axis=0) * scale
    b_eff = (b * scale + (beta - mean * scale)).reshape(1, -1)
    return w_taps.astype(MXU_DTYPE), b_eff.astype(jnp.float32)


def init_cnn_ae_v2_params(key, no_channels=1):
    keys = jax.random.split(key, 6)
    enc = [
        _fold_enc(_init_block_raw(keys[0], no_channels, 16)),
        _fold_enc(_init_block_raw(keys[1], 16, 32)),
        _fold_enc(_init_block_raw(keys[2], 32, 64)),
    ]
    dec = [
        _fold_dec(_init_block_raw(keys[3], 64, 32, transpose=True)),
        _fold_dec(_init_block_raw(keys[4], 32, 16, transpose=True)),
        _fold_dec(_init_block_raw(keys[5], 16, no_channels, transpose=True)),
    ]
    return enc, dec


# ---------------------------------------------------------------------------
# Full forward (external layout matches PyTorch: NCL)
# ---------------------------------------------------------------------------
def cnn_ae_v2_forward(x_ncl, params):
    enc, dec = params
    x = jnp.transpose(x_ncl, (0, 2, 1))        # NCL -> NLC, once
    # encoder: block(1->16), Dropout(0.5), block(16->32), Dropout(0.2), block(32->64)
    for p in enc:
        x = cnn_block_1d(x, p)                 # Dropout = identity in eval
    # decoder: inv(64->32), Dropout(0.2), inv(32->16), Dropout(0.1), inv(16->channels)
    for p in dec:
        x = cnn_block_inv_1d(x, p)
    return jnp.transpose(x, (0, 2, 1))         # NLC -> NCL, once


if __name__ == "__main__":
    key = jax.random.PRNGKey(0)
    k_params, k_x = jax.random.split(key)

    no_channels = 1
    batch, length = 2, 16                      # (N, C, L) — PyTorch Conv1d layout
    x = jax.random.normal(k_x, (batch, no_channels, length), jnp.float32)

    params = init_cnn_ae_v2_params(k_params, no_channels)
    y = jax.jit(cnn_ae_v2_forward)(x, params)
    y = jax.block_until_ready(y)

    assert y.shape == (batch, no_channels, length), y.shape
    assert y.dtype == jnp.float32
    print("KERNEL_OK")
</pallas_src>

<mosaic_0001>
module attributes {stable_mosaic.version = 11 : i64} {
  func.func @_enc_block_kernel(%arg0: i32, %arg1: memref<1x9x1xf32, #tpu.memory_space<vmem>>, %arg2: memref<1x8x1xf32, #tpu.memory_space<vmem>>, %arg3: memref<3x1x16xf32, #tpu.memory_space<vmem>>, %arg4: memref<1x16xf32, #tpu.memory_space<vmem>>, %arg5: memref<1x8x16xf32, #tpu.memory_space<vmem>>) attributes {dimension_semantics = [#tpu.dimension_semantics<parallel>], iteration_bounds = array<i64: 2>, scalar_prefetch = 0 : i64, scratch_operands = 0 : i64, tpu.core_type = #tpu.core_type<tc>, window_params = [{transform_indices = @transform_0, window_bounds = array<i64: 1, 9, 1>}, {transform_indices = @transform_1, window_bounds = array<i64: 1, 8, 1>}, {pipeline_mode = #tpu.pipeline_mode<synchronous>, transform_indices = @transform_2, window_bounds = array<i64: 3, 1, 16>}, {pipeline_mode = #tpu.pipeline_mode<synchronous>, transform_indices = @transform_3, window_bounds = array<i64: 1, 16>}, {transform_indices = @transform_4, window_bounds = array<i64: 1, 8, 16>}]} {
    %c0 = arith.constant 0 : index
    %c0_0 = arith.constant 0 : index
    %c0_1 = arith.constant 0 : index
    %0 = vector.load %arg1[%c0, %c0_0, %c0_1] : memref<1x9x1xf32, #tpu.memory_space<vmem>>, vector<1x8x1xf32>
    %1 = vector.shape_cast %0 : vector<1x8x1xf32> to vector<8x1xf32>
    %c0_2 = arith.constant 0 : index
    %c0_3 = arith.constant 0 : index
    %c0_4 = arith.constant 0 : index
    %2 = vector.load %arg3[%c0_2, %c0_3, %c0_4] : memref<3x1x16xf32, #tpu.memory_space<vmem>>, vector<1x1x16xf32>
    %3 = vector.shape_cast %2 : vector<1x1x16xf32> to vector<1x16xf32>
    %cst = arith.constant dense<0.000000e+00> : vector<8x16xf32>
    %4 = tpu.matmul %1, %3, %cst {dimension_numbers = #tpu.dot_dimension_numbers<[1], [0], [0], [1], [0, 0, 1, 1], [], []>} : vector<8x1xf32>, vector<1x16xf32>, vector<8x16xf32> -> vector<8x16xf32>
    %c0_5 = arith.constant 0 : index
    %c0_6 = arith.constant 0 : index
    %c0_7 = arith.constant 0 : index
    %5 = vector.load %arg2[%c0_5, %c0_6, %c0_7] : memref<1x8x1xf32, #tpu.memory_space<vmem>>, vector<1x8x1xf32>
    %6 = vector.shape_cast %5 : vector<1x8x1xf32> to vector<8x1xf32>
    %c1 = arith.constant 1 : index
    %c0_8 = arith.constant 0 : index
    %c0_9 = arith.constant 0 : index
    %7 = vector.load %arg3[%c1, %c0_8, %c0_9] : memref<3x1x16xf32, #tpu.memory_space<vmem>>, vector<1x1x16xf32>
    %8 = vector.shape_cast %7 : vector<1x1x16xf32> to vector<1x16xf32>
    %cst_10 = arith.constant dense<0.000000e+00> : vector<8x16xf32>
    %9 = tpu.matmul %6, %8, %cst_10 {dimension_numbers = #tpu.dot_dimension_numbers<[1], [0], [0], [1], [0, 0, 1, 1], [], []>} : vector<8x1xf32>, vector<1x16xf32>, vector<8x16xf32> -> vector<8x16xf32>
    %10 = arith.addf %4, %9 : vector<8x16xf32>
    %c0_11 = arith.constant 0 : index
    %c1_12 = arith.constant 1 : index
    %c0_13 = arith.constant 0 : index
    %11 = vector.load %arg1[%c0_11, %c1_12, %c0_13] : memref<1x9x1xf32, #tpu.memory_space<vmem>>, vector<1x8x1xf32>
    %12 = vector.shape_cast %11 : vector<1x8x1xf32> to vector<8x1xf32>
    %c2 = arith.constant 2 : index
    %c0_14 = arith.constant 0 : index
    %c0_15 = arith.constant 0 : index
    %13 = vector.load %arg3[%c2, %c0_14, %c0_15] : memref<3x1x16xf32, #tpu.memory_space<vmem>>, vector<1x1x16xf32>
    %14 = vector.shape_cast %13 : vector<1x1x16xf32> to vector<1x16xf32>
    %cst_16 = arith.constant dense<0.000000e+00> : vector<8x16xf32>
    %15 = tpu.matmul %12, %14, %cst_16 {dimension_numbers = #tpu.dot_dimension_numbers<[1], [0], [0], [1], [0, 0, 1, 1], [], []>} : vector<8x1xf32>, vector<1x16xf32>, vector<8x16xf32> -> vector<8x16xf32>
    %16 = arith.addf %10, %15 : vector<8x16xf32>
    %c0_17 = arith.constant 0 : index
    %c0_18 = arith.constant 0 : index
    %17 = vector.load %arg4[%c0_17, %c0_18] : memref<1x16xf32, #tpu.memory_space<vmem>>, vector<1x16xf32>
    %18 = vector.broadcast %17 : vector<1x16xf32> to vector<8x16xf32>
    %19 = arith.addf %16, %18 : vector<8x16xf32>
    %cst_19 = arith.constant 0.000000e+00 : f32
    %20 = vector.broadcast %cst_19 : f32 to vector<8x16xf32>
    %21 = arith.maximumf %19, %20 : vector<8x16xf32>
    %c0_20 = arith.constant 0 : index
    %c0_21 = arith.constant 0 : index
    %c0_22 = arith.constant 0 : index
    %22 = vector.load %arg5[%c0_20, %c0_21, %c0_22] : memref<1x8x16xf32, #tpu.memory_space<vmem>>, vector<1x8x16xf32>
    %23 = vector.shape_cast %22 : vector<1x8x16xf32> to vector<8x16xf32>
    %24 = vector.shape_cast %21 : vector<8x16xf32> to vector<1x8x16xf32>
    tpu.vector_store %arg5[%c0_20, %c0_21, %c0_22], %24 {strides = array<i32>} : memref<1x8x16xf32, #tpu.memory_space<vmem>>, vector<1x8x16xf32>,
    return
  }
  func.func @transform_0(%arg0: i32) -> (i32, i32, i32) {
    %c0_i32 = arith.constant 0 : i32
    %c0_i32_0 = arith.constant 0 : i32
    %c0_i32_1 = arith.constant 0 : i32
    return %arg0, %c0_i32, %c0_i32_0 : i32, i32, i32
  }
  func.func @transform_1(%arg0: i32) -> (i32, i32, i32) {
    %c0_i32 = arith.constant 0 : i32
    %c0_i32_0 = arith.constant 0 : i32
    %c0_i32_1 = arith.constant 0 : i32
    return %arg0, %c0_i32, %c0_i32_0 : i32, i32, i32
  }
  func.func @transform_2(%arg0: i32) -> (i32, i32, i32) {
    %c0_i32 = arith.constant 0 : i32
    %c0_i32_0 = arith.constant 0 : i32
    %c0_i32_1 = arith.constant 0 : i32
    %c0_i32_2 = arith.constant 0 : i32
    return %c0_i32, %c0_i32_0, %c0_i32_1 : i32, i32, i32
  }
  func.func @transform_3(%arg0: i32) -> (i32, i32) {
    %c0_i32 = arith.constant 0 : i32
    %c0_i32_0 = arith.constant 0 : i32
    %c0_i32_1 = arith.constant 0 : i32
    return %c0_i32, %c0_i32_0 : i32, i32
  }
  func.func @transform_4(%arg0: i32) -> (i32, i32, i32) {
    %c0_i32 = arith.constant 0 : i32
    %c0_i32_0 = arith.constant 0 : i32
    %c0_i32_1 = arith.constant 0 : i32
    return %arg0, %c0_i32, %c0_i32_0 : i32, i32, i32
  }
}

module attributes {stable_mosaic.version = 11 : i64} {
  func.func @_enc_block_kernel(%arg0: i32, %arg1: memref<1x5x16xf32, #tpu.memory_space<vmem>>, %arg2: memref<1x4x16xf32, #tpu.memory_space<vmem>>, %arg3: memref<3x16x32xf32, #tpu.memory_space<vmem>>, %arg4: memref<1x32xf32, #tpu.memory_space<vmem>>, %arg5: memref<1x4x32xf32, #tpu.memory_space<vmem>>) attributes {dimension_semantics = [#tpu.dimension_semantics<parallel>], iteration_bounds = array<i64: 2>, scalar_prefetch = 0 : i64, scratch_operands = 0 : i64, tpu.core_type = #tpu.core_type<tc>, window_params = [{transform_indices = @transform_0, window_bounds = array<i64: 1, 5, 16>}, {transform_indices = @transform_1, window_bounds = array<i64: 1, 4, 16>}, {pipeline_mode = #tpu.pipeline_mode<synchronous>, transform_indices = @transform_2, window_bounds = array<i64: 3, 16, 32>}, {pipeline_mode = #tpu.pipeline_mode<synchronous>, transform_indices = @transform_3, window_bounds = array<i64: 1, 32>}, {transform_indices = @transform_4, window_bounds = array<i64: 1, 4, 32>}]} {
    %c0 = arith.constant 0 : index
    %c0_0 = arith.constant 0 : index
    %c0_1 = arith.constant 0 : index
    %0 = vector.load %arg1[%c0, %c0_0, %c0_1] : memref<1x5x16xf32, #tpu.memory_space<vmem>>, vector<1x4x16xf32>
    %1 = vector.shape_cast %0 : vector<1x4x16xf32> to vector<4x16xf32>
    %c0_2 = arith.constant 0 : index
    %c0_3 = arith.constant 0 : index
    %c0_4 = arith.constant 0 : index
    %2 = vector.load %arg3[%c0_2, %c0_3, %c0_4] : memref<3x16x32xf32, #tpu.memory_space<vmem>>, vector<1x16x32xf32>
    %3 = vector.shape_cast %2 : vector<1x16x32xf32> to vector<16x32xf32>
    %cst = arith.constant dense<0.000000e+00> : vector<4x32xf32>
    %4 = tpu.matmul %1, %3, %cst {dimension_numbers = #tpu.dot_dimension_numbers<[1], [0], [0], [1], [0, 0, 1, 1], [], []>} : vector<4x16xf32>, vector<16x32xf32>, vector<4x32xf32> -> vector<4x32xf32>
    %c0_5 = arith.constant 0 : index
    %c0_6 = arith.constant 0 : index
    %c0_7 = arith.constant 0 : index
    %5 = vector.load %arg2[%c0_5, %c0_6, %c0_7] : memref<1x4x16xf32, #tpu.memory_space<vmem>>, vector<1x4x16xf32>
    %6 = vector.shape_cast %5 : vector<1x4x16xf32> to vector<4x16xf32>
    %c1 = arith.constant 1 : index
    %c0_8 = arith.constant 0 : index
    %c0_9 = arith.constant 0 : index
    %7 = vector.load %arg3[%c1, %c0_8, %c0_9] : memref<3x16x32xf32, #tpu.memory_space<vmem>>, vector<1x16x32xf32>
    %8 = vector.shape_cast %7 : vector<1x16x32xf32> to vector<16x32xf32>
    %cst_10 = arith.constant dense<0.000000e+00> : vector<4x32xf32>
    %9 = tpu.matmul %6, %8, %cst_10 {dimension_numbers = #tpu.dot_dimension_numbers<[1], [0], [0], [1], [0, 0, 1, 1], [], []>} : vector<4x16xf32>, vector<16x32xf32>, vector<4x32xf32> -> vector<4x32xf32>
    %10 = arith.addf %4, %9 : vector<4x32xf32>
    %c0_11 = arith.constant 0 : index
    %c1_12 = arith.constant 1 : index
    %c0_13 = arith.constant 0 : index
    %11 = vector.load %arg1[%c0_11, %c1_12, %c0_13] : memref<1x5x16xf32, #tpu.memory_space<vmem>>, vector<1x4x16xf32>
    %12 = vector.shape_cast %11 : vector<1x4x16xf32> to vector<4x16xf32>
    %c2 = arith.constant 2 : index
    %c0_14 = arith.constant 0 : index
    %c0_15 = arith.constant 0 : index
    %13 = vector.load %arg3[%c2, %c0_14, %c0_15] : memref<3x16x32xf32, #tpu.memory_space<vmem>>, vector<1x16x32xf32>
    %14 = vector.shape_cast %13 : vector<1x16x32xf32> to vector<16x32xf32>
    %cst_16 = arith.constant dense<0.000000e+00> : vector<4x32xf32>
    %15 = tpu.matmul %12, %14, %cst_16 {dimension_numbers = #tpu.dot_dimension_numbers<[1], [0], [0], [1], [0, 0, 1, 1], [], []>} : vector<4x16xf32>, vector<16x32xf32>, vector<4x32xf32> -> vector<4x32xf32>
    %16 = arith.addf %10, %15 : vector<4x32xf32>
    %c0_17 = arith.constant 0 : index
    %c0_18 = arith.constant 0 : index
    %17 = vector.load %arg4[%c0_17, %c0_18] : memref<1x32xf32, #tpu.memory_space<vmem>>, vector<1x32xf32>
    %18 = vector.broadcast %17 : vector<1x32xf32> to vector<4x32xf32>
    %19 = arith.addf %16, %18 : vector<4x32xf32>
    %cst_19 = arith.constant 0.000000e+00 : f32
    %20 = vector.broadcast %cst_19 : f32 to vector<4x32xf32>
    %21 = arith.maximumf %19, %20 : vector<4x32xf32>
    %c0_20 = arith.constant 0 : index
    %c0_21 = arith.constant 0 : index
    %c0_22 = arith.constant 0 : index
    %22 = vector.load %arg5[%c0_20, %c0_21, %c0_22] : memref<1x4x32xf32, #tpu.memory_space<vmem>>, vector<1x4x32xf32>
    %23 = vector.shape_cast %22 : vector<1x4x32xf32> to vector<4x32xf32>
    %24 = vector.shape_cast %21 : vector<4x32xf32> to vector<1x4x32xf32>
    tpu.vector_store %arg5[%c0_20, %c0_21, %c0_22], %24 {strides = array<i32>} : memref<1x4x32xf32, #tpu.memory_space<vmem>>, vector<1x4x32xf32>,
    return
  }
  func.func @transform_0(%arg0: i32) -> (i32, i32, i32) {
    %c0_i32 = arith.constant 0 : i32
    %c0_i32_0 = arith.constant 0 : i32
    %c0_i32_1 = arith.constant 0 : i32
    return %arg0, %c0_i32, %c0_i32_0 : i32, i32, i32
  }
  func.func @transform_1(%arg0: i32) -> (i32, i32, i32) {
    %c0_i32 = arith.constant 0 : i32
    %c0_i32_0 = arith.constant 0 : i32
    %c0_i32_1 = arith.constant 0 : i32
    return %arg0, %c0_i32, %c0_i32_0 : i32, i32, i32
  }
  func.func @transform_2(%arg0: i32) -> (i32, i32, i32) {
    %c0_i32 = arith.constant 0 : i32
    %c0_i32_0 = arith.constant 0 : i32
    %c0_i32_1 = arith.constant 0 : i32
    %c0_i32_2 = arith.constant 0 : i32
    return %c0_i32, %c0_i32_0, %c0_i32_1 : i32, i32, i32
  }
  func.func @transform_3(%arg0: i32) -> (i32, i32) {
    %c0_i32 = arith.constant 0 : i32
    %c0_i32_0 = arith.constant 0 : i32
    %c0_i32_1 = arith.constant 0 : i32
    return %c0_i32, %c0_i32_0 : i32, i32
  }
  func.func @transform_4(%arg0: i32) -> (i32, i32, i32) {
    %c0_i32 = arith.constant 0 : i32
    %c0_i32_0 = arith.constant 0 : i32
    %c0_i32_1 = arith.constant 0 : i32
    return %arg0, %c0_i32, %c0_i32_0 : i32, i32, i32
  }
}

module attributes {stable_mosaic.version = 11 : i64} {
  func.func @_enc_block_kernel(%arg0: i32, %arg1: memref<1x3x32xf32, #tpu.memory_space<vmem>>, %arg2: memref<1x2x32xf32, #tpu.memory_space<vmem>>, %arg3: memref<3x32x64xf32, #tpu.memory_space<vmem>>, %arg4: memref<1x64xf32, #tpu.memory_space<vmem>>, %arg5: memref<1x2x64xf32, #tpu.memory_space<vmem>>) attributes {dimension_semantics = [#tpu.dimension_semantics<parallel>], iteration_bounds = array<i64: 2>, scalar_prefetch = 0 : i64, scratch_operands = 0 : i64, tpu.core_type = #tpu.core_type<tc>, window_params = [{transform_indices = @transform_0, window_bounds = array<i64: 1, 3, 32>}, {transform_indices = @transform_1, window_bounds = array<i64: 1, 2, 32>}, {pipeline_mode = #tpu.pipeline_mode<synchronous>, transform_indices = @transform_2, window_bounds = array<i64: 3, 32, 64>}, {pipeline_mode = #tpu.pipeline_mode<synchronous>, transform_indices = @transform_3, window_bounds = array<i64: 1, 64>}, {transform_indices = @transform_4, window_bounds = array<i64: 1, 2, 64>}]} {
    %c0 = arith.constant 0 : index
    %c0_0 = arith.constant 0 : index
    %c0_1 = arith.constant 0 : index
    %0 = vector.load %arg1[%c0, %c0_0, %c0_1] : memref<1x3x32xf32, #tpu.memory_space<vmem>>, vector<1x2x32xf32>
    %1 = vector.shape_cast %0 : vector<1x2x32xf32> to vector<2x32xf32>
    %c0_2 = arith.constant 0 : index
    %c0_3 = arith.constant 0 : index
    %c0_4 = arith.constant 0 : index
    %2 = vector.load %arg3[%c0_2, %c0_3, %c0_4] : memref<3x32x64xf32, #tpu.memory_space<vmem>>, vector<1x32x64xf32>
    %3 = vector.shape_cast %2 : vector<1x32x64xf32> to vector<32x64xf32>
    %cst = arith.constant dense<0.000000e+00> : vector<2x64xf32>
    %4 = tpu.matmul %1, %3, %cst {dimension_numbers = #tpu.dot_dimension_numbers<[1], [0], [0], [1], [0, 0, 1, 1], [], []>} : vector<2x32xf32>, vector<32x64xf32>, vector<2x64xf32> -> vector<2x64xf32>
    %c0_5 = arith.constant 0 : index
    %c0_6 = arith.constant 0 : index
    %c0_7 = arith.constant 0 : index
    %5 = vector.load %arg2[%c0_5, %c0_6, %c0_7] : memref<1x2x32xf32, #tpu.memory_space<vmem>>, vector<1x2x32xf32>
    %6 = vector.shape_cast %5 : vector<1x2x32xf32> to vector<2x32xf32>
    %c1 = arith.constant 1 : index
    %c0_8 = arith.constant 0 : index
    %c0_9 = arith.constant 0 : index
    %7 = vector.load %arg3[%c1, %c0_8, %c0_9] : memref<3x32x64xf32, #tpu.memory_space<vmem>>, vector<1x32x64xf32>
    %8 = vector.shape_cast %7 : vector<1x32x64xf32> to vector<32x64xf32>
    %cst_10 = arith.constant dense<0.000000e+00> : vector<2x64xf32>
    %9 = tpu.matmul %6, %8, %cst_10 {dimension_numbers = #tpu.dot_dimension_numbers<[1], [0], [0], [1], [0, 0, 1, 1], [], []>} : vector<2x32xf32>, vector<32x64xf32>, vector<2x64xf32> -> vector<2x64xf32>
    %10 = arith.addf %4, %9 : vector<2x64xf32>
    %c0_11 = arith.constant 0 : index
    %c1_12 = arith.constant 1 : index
    %c0_13 = arith.constant 0 : index
    %11 = vector.load %arg1[%c0_11, %c1_12, %c0_13] : memref<1x3x32xf32, #tpu.memory_space<vmem>>, vector<1x2x32xf32>
    %12 = vector.shape_cast %11 : vector<1x2x32xf32> to vector<2x32xf32>
    %c2 = arith.constant 2 : index
    %c0_14 = arith.constant 0 : index
    %c0_15 = arith.constant 0 : index
    %13 = vector.load %arg3[%c2, %c0_14, %c0_15] : memref<3x32x64xf32, #tpu.memory_space<vmem>>, vector<1x32x64xf32>
    %14 = vector.shape_cast %13 : vector<1x32x64xf32> to vector<32x64xf32>
    %cst_16 = arith.constant dense<0.000000e+00> : vector<2x64xf32>
    %15 = tpu.matmul %12, %14, %cst_16 {dimension_numbers = #tpu.dot_dimension_numbers<[1], [0], [0], [1], [0, 0, 1, 1], [], []>} : vector<2x32xf32>, vector<32x64xf32>, vector<2x64xf32> -> vector<2x64xf32>
    %16 = arith.addf %10, %15 : vector<2x64xf32>
    %c0_17 = arith.constant 0 : index
    %c0_18 = arith.constant 0 : index
    %17 = vector.load %arg4[%c0_17, %c0_18] : memref<1x64xf32, #tpu.memory_space<vmem>>, vector<1x64xf32>
    %18 = vector.broadcast %17 : vector<1x64xf32> to vector<2x64xf32>
    %19 = arith.addf %16, %18 : vector<2x64xf32>
    %cst_19 = arith.constant 0.000000e+00 : f32
    %20 = vector.broadcast %cst_19 : f32 to vector<2x64xf32>
    %21 = arith.maximumf %19, %20 : vector<2x64xf32>
    %c0_20 = arith.constant 0 : index
    %c0_21 = arith.constant 0 : index
    %c0_22 = arith.constant 0 : index
    %22 = vector.load %arg5[%c0_20, %c0_21, %c0_22] : memref<1x2x64xf32, #tpu.memory_space<vmem>>, vector<1x2x64xf32>
    %23 = vector.shape_cast %22 : vector<1x2x64xf32> to vector<2x64xf32>
    %24 = vector.shape_cast %21 : vector<2x64xf32> to vector<1x2x64xf32>
    tpu.vector_store %arg5[%c0_20, %c0_21, %c0_22], %24 {strides = array<i32>} : memref<1x2x64xf32, #tpu.memory_space<vmem>>, vector<1x2x64xf32>,
    return
  }
  func.func @transform_0(%arg0: i32) -> (i32, i32, i32) {
    %c0_i32 = arith.constant 0 : i32
    %c0_i32_0 = arith.constant 0 : i32
    %c0_i32_1 = arith.constant 0 : i32
    return %arg0, %c0_i32, %c0_i32_0 : i32, i32, i32
  }
  func.func @transform_1(%arg0: i32) -> (i32, i32, i32) {
    %c0_i32 = arith.constant 0 : i32
    %c0_i32_0 = arith.constant 0 : i32
    %c0_i32_1 = arith.constant 0 : i32
    return %arg0, %c0_i32, %c0_i32_0 : i32, i32, i32
  }
  func.func @transform_2(%arg0: i32) -> (i32, i32, i32) {
    %c0_i32 = arith.constant 0 : i32
    %c0_i32_0 = arith.constant 0 : i32
    %c0_i32_1 = arith.constant 0 : i32
    %c0_i32_2 = arith.constant 0 : i32
    return %c0_i32, %c0_i32_0, %c0_i32_1 : i32, i32, i32
  }
  func.func @transform_3(%arg0: i32) -> (i32, i32) {
    %c0_i32 = arith.constant 0 : i32
    %c0_i32_0 = arith.constant 0 : i32
    %c0_i32_1 = arith.constant 0 : i32
    return %c0_i32, %c0_i32_0 : i32, i32
  }
  func.func @transform_4(%arg0: i32) -> (i32, i32, i32) {
    %c0_i32 = arith.constant 0 : i32
    %c0_i32_0 = arith.constant 0 : i32
    %c0_i32_1 = arith.constant 0 : i32
    return %arg0, %c0_i32, %c0_i32_0 : i32, i32, i32
  }
}

module attributes {stable_mosaic.version = 11 : i64} {
  func.func @_dec_block_kernel(%arg0: i32, %arg1: memref<1x3x64xf32, #tpu.memory_space<vmem>>, %arg2: memref<3x64x32xf32, #tpu.memory_space<vmem>>, %arg3: memref<1x32xf32, #tpu.memory_space<vmem>>, %arg4: memref<1x2x64xf32, #tpu.memory_space<vmem>>) attributes {dimension_semantics = [#tpu.dimension_semantics<parallel>], iteration_bounds = array<i64: 2>, scalar_prefetch = 0 : i64, scratch_operands = 0 : i64, tpu.core_type = #tpu.core_type<tc>, window_params = [{transform_indices = @transform_0, window_bounds = array<i64: 1, 3, 64>}, {pipeline_mode = #tpu.pipeline_mode<synchronous>, transform_indices = @transform_1, window_bounds = array<i64: 3, 64, 32>}, {pipeline_mode = #tpu.pipeline_mode<synchronous>, transform_indices = @transform_2, window_bounds = array<i64: 1, 32>}, {transform_indices = @transform_3, window_bounds = array<i64: 1, 2, 64>}]} {
    %c0 = arith.constant 0 : index
    %c0_0 = arith.constant 0 : index
    %c0_1 = arith.constant 0 : index
    %0 = vector.load %arg1[%c0, %c0_0, %c0_1] : memref<1x3x64xf32, #tpu.memory_space<vmem>>, vector<1x2x64xf32>
    %1 = vector.shape_cast %0 : vector<1x2x64xf32> to vector<2x64xf32>
    %c0_2 = arith.constant 0 : index
    %c1 = arith.constant 1 : index
    %c0_3 = arith.constant 0 : index
    %2 = vector.load %arg1[%c0_2, %c1, %c0_3] : memref<1x3x64xf32, #tpu.memory_space<vmem>>, vector<1x2x64xf32>
    %3 = vector.shape_cast %2 : vector<1x2x64xf32> to vector<2x64xf32>
    %c0_4 = arith.constant 0 : index
    %c0_5 = arith.constant 0 : index
    %c0_6 = arith.constant 0 : index
    %4 = vector.load %arg2[%c0_4, %c0_5, %c0_6] : memref<3x64x32xf32, #tpu.memory_space<vmem>>, vector<1x64x32xf32>
    %5 = vector.shape_cast %4 : vector<1x64x32xf32> to vector<64x32xf32>
    %cst = arith.constant dense<0.000000e+00> : vector<2x32xf32>
    %6 = tpu.matmul %1, %5, %cst {dimension_numbers = #tpu.dot_dimension_numbers<[1], [0], [0], [1], [0, 0, 1, 1], [], []>} : vector<2x64xf32>, vector<64x32xf32>, vector<2x32xf32> -> vector<2x32xf32>
    %c0_7 = arith.constant 0 : index
    %c0_8 = arith.constant 0 : index
    %7 = vector.load %arg3[%c0_7, %c0_8] : memref<1x32xf32, #tpu.memory_space<vmem>>, vector<1x32xf32>
    %8 = vector.broadcast %7 : vector<1x32xf32> to vector<2x32xf32>
    %9 = arith.addf %6, %8 : vector<2x32xf32>
    %c1_9 = arith.constant 1 : index
    %c0_10 = arith.constant 0 : index
    %c0_11 = arith.constant 0 : index
    %10 = vector.load %arg2[%c1_9, %c0_10, %c0_11] : memref<3x64x32xf32, #tpu.memory_space<vmem>>, vector<1x64x32xf32>
    %11 = vector.shape_cast %10 : vector<1x64x32xf32> to vector<64x32xf32>
    %cst_12 = arith.constant dense<0.000000e+00> : vector<2x32xf32>
    %12 = tpu.matmul %1, %11, %cst_12 {dimension_numbers = #tpu.dot_dimension_numbers<[1], [0], [0], [1], [0, 0, 1, 1], [], []>} : vector<2x64xf32>, vector<64x32xf32>, vector<2x32xf32> -> vector<2x32xf32>
    %c2 = arith.constant 2 : index
    %c0_13 = arith.constant 0 : index
    %c0_14 = arith.constant 0 : index
    %13 = vector.load %arg2[%c2, %c0_13, %c0_14] : memref<3x64x32xf32, #tpu.memory_space<vmem>>, vector<1x64x32xf32>
    %14 = vector.shape_cast %13 : vector<1x64x32xf32> to vector<64x32xf32>
    %cst_15 = arith.constant dense<0.000000e+00> : vector<2x32xf32>
    %15 = tpu.matmul %3, %14, %cst_15 {dimension_numbers = #tpu.dot_dimension_numbers<[1], [0], [0], [1], [0, 0, 1, 1], [], []>} : vector<2x64xf32>, vector<64x32xf32>, vector<2x32xf32> -> vector<2x32xf32>
    %16 = arith.addf %12, %15 : vector<2x32xf32>
    %c0_16 = arith.constant 0 : index
    %c0_17 = arith.constant 0 : index
    %17 = vector.load %arg3[%c0_16, %c0_17] : memref<1x32xf32, #tpu.memory_space<vmem>>, vector<1x32xf32>
    %18 = vector.broadcast %17 : vector<1x32xf32> to vector<2x32xf32>
    %19 = arith.addf %16, %18 : vector<2x32xf32>
    %cst_18 = arith.constant 0.000000e+00 : f32
    %20 = vector.broadcast %cst_18 : f32 to vector<2x32xf32>
    %21 = arith.maximumf %9, %20 : vector<2x32xf32>
    %c0_19 = arith.constant 0 : index
    %c0_20 = arith.constant 0 : index
    %c0_21 = arith.constant 0 : index
    %22 = vector.load %arg4[%c0_19, %c0_20, %c0_21] : memref<1x2x64xf32, #tpu.memory_space<vmem>>, vector<1x2x32xf32>
    %23 = vector.shape_cast %22 : vector<1x2x32xf32> to vector<2x32xf32>
    %24 = vector.shape_cast %21 : vector<2x32xf32> to vector<1x2x32xf32>
    tpu.vector_store %arg4[%c0_19, %c0_20, %c0_21], %24 {strides = array<i32>} : memref<1x2x64xf32, #tpu.memory_space<vmem>>, vector<1x2x32xf32>,
    %cst_22 = arith.constant 0.000000e+00 : f32
    %25 = vector.broadcast %cst_22 : f32 to vector<2x32xf32>
    %26 = arith.maximumf %19, %25 : vector<2x32xf32>
    %c0_23 = arith.constant 0 : index
    %c0_24 = arith.constant 0 : index
    %c32 = arith.constant 32 : index
    %27 = vector.load %arg4[%c0_23, %c0_24, %c32] : memref<1x2x64xf32, #tpu.memory_space<vmem>>, vector<1x2x32xf32>
    %28 = vector.shape_cast %27 : vector<1x2x32xf32> to vector<2x32xf32>
    %29 = vector.shape_cast %26 : vector<2x32xf32> to vector<1x2x32xf32>
    tpu.vector_store %arg4[%c0_23, %c0_24, %c32], %29 {strides = array<i32>} : memref<1x2x64xf32, #tpu.memory_space<vmem>>, vector<1x2x32xf32>,
    return
  }
  func.func @transform_0(%arg0: i32) -> (i32, i32, i32) {
    %c0_i32 = arith.constant 0 : i32
    %c0_i32_0 = arith.constant 0 : i32
    %c0_i32_1 = arith.constant 0 : i32
    return %arg0, %c0_i32, %c0_i32_0 : i32, i32, i32
  }
  func.func @transform_1(%arg0: i32) -> (i32, i32, i32) {
    %c0_i32 = arith.constant 0 : i32
    %c0_i32_0 = arith.constant 0 : i32
    %c0_i32_1 = arith.constant 0 : i32
    %c0_i32_2 = arith.constant 0 : i32
    return %c0_i32, %c0_i32_0, %c0_i32_1 : i32, i32, i32
  }
  func.func @transform_2(%arg0: i32) -> (i32, i32) {
    %c0_i32 = arith.constant 0 : i32
    %c0_i32_0 = arith.constant 0 : i32
    %c0_i32_1 = arith.constant 0 : i32
    return %c0_i32, %c0_i32_0 : i32, i32
  }
  func.func @transform_3(%arg0: i32) -> (i32, i32, i32) {
    %c0_i32 = arith.constant 0 : i32
    %c0_i32_0 = arith.constant 0 : i32
    %c0_i32_1 = arith.constant 0 : i32
    return %arg0, %c0_i32, %c0_i32_0 : i32, i32, i32
  }
}

module attributes {stable_mosaic.version = 11 : i64} {
  func.func @_dec_block_kernel(%arg0: i32, %arg1: memref<1x5x32xf32, #tpu.memory_space<vmem>>, %arg2: memref<3x32x16xf32, #tpu.memory_space<vmem>>, %arg3: memref<1x16xf32, #tpu.memory_space<vmem>>, %arg4: memref<1x4x32xf32, #tpu.memory_space<vmem>>) attributes {dimension_semantics = [#tpu.dimension_semantics<parallel>], iteration_bounds = array<i64: 2>, scalar_prefetch = 0 : i64, scratch_operands = 0 : i64, tpu.core_type = #tpu.core_type<tc>, window_params = [{transform_indices = @transform_0, window_bounds = array<i64: 1, 5, 32>}, {pipeline_mode = #tpu.pipeline_mode<synchronous>, transform_indices = @transform_1, window_bounds = array<i64: 3, 32, 16>}, {pipeline_mode = #tpu.pipeline_mode<synchronous>, transform_indices = @transform_2, window_bounds = array<i64: 1, 16>}, {transform_indices = @transform_3, window_bounds = array<i64: 1, 4, 32>}]} {
    %c0 = arith.constant 0 : index
    %c0_0 = arith.constant 0 : index
    %c0_1 = arith.constant 0 : index
    %0 = vector.load %arg1[%c0, %c0_0, %c0_1] : memref<1x5x32xf32, #tpu.memory_space<vmem>>, vector<1x4x32xf32>
    %1 = vector.shape_cast %0 : vector<1x4x32xf32> to vector<4x32xf32>
    %c0_2 = arith.constant 0 : index
    %c1 = arith.constant 1 : index
    %c0_3 = arith.constant 0 : index
    %2 = vector.load %arg1[%c0_2, %c1, %c0_3] : memref<1x5x32xf32, #tpu.memory_space<vmem>>, vector<1x4x32xf32>
    %3 = vector.shape_cast %2 : vector<1x4x32xf32> to vector<4x32xf32>
    %c0_4 = arith.constant 0 : index
    %c0_5 = arith.constant 0 : index
    %c0_6 = arith.constant 0 : index
    %4 = vector.load %arg2[%c0_4, %c0_5, %c0_6] : memref<3x32x16xf32, #tpu.memory_space<vmem>>, vector<1x32x16xf32>
    %5 = vector.shape_cast %4 : vector<1x32x16xf32> to vector<32x16xf32>
    %cst = arith.constant dense<0.000000e+00> : vector<4x16xf32>
    %6 = tpu.matmul %1, %5, %cst {dimension_numbers = #tpu.dot_dimension_numbers<[1], [0], [0], [1], [0, 0, 1, 1], [], []>} : vector<4x32xf32>, vector<32x16xf32>, vector<4x16xf32> -> vector<4x16xf32>
    %c0_7 = arith.constant 0 : index
    %c0_8 = arith.constant 0 : index
    %7 = vector.load %arg3[%c0_7, %c0_8] : memref<1x16xf32, #tpu.memory_space<vmem>>, vector<1x16xf32>
    %8 = vector.broadcast %7 : vector<1x16xf32> to vector<4x16xf32>
    %9 = arith.addf %6, %8 : vector<4x16xf32>
    %c1_9 = arith.constant 1 : index
    %c0_10 = arith.constant 0 : index
    %c0_11 = arith.constant 0 : index
    %10 = vector.load %arg2[%c1_9, %c0_10, %c0_11] : memref<3x32x16xf32, #tpu.memory_space<vmem>>, vector<1x32x16xf32>
    %11 = vector.shape_cast %10 : vector<1x32x16xf32> to vector<32x16xf32>
    %cst_12 = arith.constant dense<0.000000e+00> : vector<4x16xf32>
    %12 = tpu.matmul %1, %11, %cst_12 {dimension_numbers = #tpu.dot_dimension_numbers<[1], [0], [0], [1], [0, 0, 1, 1], [], []>} : vector<4x32xf32>, vector<32x16xf32>, vector<4x16xf32> -> vector<4x16xf32>
    %c2 = arith.constant 2 : index
    %c0_13 = arith.constant 0 : index
    %c0_14 = arith.constant 0 : index
    %13 = vector.load %arg2[%c2, %c0_13, %c0_14] : memref<3x32x16xf32, #tpu.memory_space<vmem>>, vector<1x32x16xf32>
    %14 = vector.shape_cast %13 : vector<1x32x16xf32> to vector<32x16xf32>
    %cst_15 = arith.constant dense<0.000000e+00> : vector<4x16xf32>
    %15 = tpu.matmul %3, %14, %cst_15 {dimension_numbers = #tpu.dot_dimension_numbers<[1], [0], [0], [1], [0, 0, 1, 1], [], []>} : vector<4x32xf32>, vector<32x16xf32>, vector<4x16xf32> -> vector<4x16xf32>
    %16 = arith.addf %12, %15 : vector<4x16xf32>
    %c0_16 = arith.constant 0 : index
    %c0_17 = arith.constant 0 : index
    %17 = vector.load %arg3[%c0_16, %c0_17] : memref<1x16xf32, #tpu.memory_space<vmem>>, vector<1x16xf32>
    %18 = vector.broadcast %17 : vector<1x16xf32> to vector<4x16xf32>
    %19 = arith.addf %16, %18 : vector<4x16xf32>
    %cst_18 = arith.constant 0.000000e+00 : f32
    %20 = vector.broadcast %cst_18 : f32 to vector<4x16xf32>
    %21 = arith.maximumf %9, %20 : vector<4x16xf32>
    %c0_19 = arith.constant 0 : index
    %c0_20 = arith.constant 0 : index
    %c0_21 = arith.constant 0 : index
    %22 = vector.load %arg4[%c0_19, %c0_20, %c0_21] : memref<1x4x32xf32, #tpu.memory_space<vmem>>, vector<1x4x16xf32>
    %23 = vector.shape_cast %22 : vector<1x4x16xf32> to vector<4x16xf32>
    %24 = vector.shape_cast %21 : vector<4x16xf32> to vector<1x4x16xf32>
    tpu.vector_store %arg4[%c0_19, %c0_20, %c0_21], %24 {strides = array<i32>} : memref<1x4x32xf32, #tpu.memory_space<vmem>>, vector<1x4x16xf32>,
    %cst_22 = arith.constant 0.000000e+00 : f32
    %25 = vector.broadcast %cst_22 : f32 to vector<4x16xf32>
    %26 = arith.maximumf %19, %25 : vector<4x16xf32>
    %c0_23 = arith.constant 0 : index
    %c0_24 = arith.constant 0 : index
    %c16 = arith.constant 16 : index
    %27 = vector.load %arg4[%c0_23, %c0_24, %c16] : memref<1x4x32xf32, #tpu.memory_space<vmem>>, vector<1x4x16xf32>
    %28 = vector.shape_cast %27 : vector<1x4x16xf32> to vector<4x16xf32>
    %29 = vector.shape_cast %26 : vector<4x16xf32> to vector<1x4x16xf32>
    tpu.vector_store %arg4[%c0_23, %c0_24, %c16], %29 {strides = array<i32>} : memref<1x4x32xf32, #tpu.memory_space<vmem>>, vector<1x4x16xf32>,
    return
  }
  func.func @transform_0(%arg0: i32) -> (i32, i32, i32) {
    %c0_i32 = arith.constant 0 : i32
    %c0_i32_0 = arith.constant 0 : i32
    %c0_i32_1 = arith.constant 0 : i32
    return %arg0, %c0_i32, %c0_i32_0 : i32, i32, i32
  }
  func.func @transform_1(%arg0: i32) -> (i32, i32, i32) {
    %c0_i32 = arith.constant 0 : i32
    %c0_i32_0 = arith.constant 0 : i32
    %c0_i32_1 = arith.constant 0 : i32
    %c0_i32_2 = arith.constant 0 : i32
    return %c0_i32, %c0_i32_0, %c0_i32_1 : i32, i32, i32
  }
  func.func @transform_2(%arg0: i32) -> (i32, i32) {
    %c0_i32 = arith.constant 0 : i32
    %c0_i32_0 = arith.constant 0 : i32
    %c0_i32_1 = arith.constant 0 : i32
    return %c0_i32, %c0_i32_0 : i32, i32
  }
  func.func @transform_3(%arg0: i32) -> (i32, i32, i32) {
    %c0_i32 = arith.constant 0 : i32
    %c0_i32_0 = arith.constant 0 : i32
    %c0_i32_1 = arith.constant 0 : i32
    return %arg0, %c0_i32, %c0_i32_0 : i32, i32, i32
  }
}

module attributes {stable_mosaic.version = 11 : i64} {
  func.func @_dec_block_kernel(%arg0: i32, %arg1: memref<1x9x16xf32, #tpu.memory_space<vmem>>, %arg2: memref<3x16x1xf32, #tpu.memory_space<vmem>>, %arg3: memref<1x1xf32, #tpu.memory_space<vmem>>, %arg4: memref<1x8x2xf32, #tpu.memory_space<vmem>>) attributes {dimension_semantics = [#tpu.dimension_semantics<parallel>], iteration_bounds = array<i64: 2>, scalar_prefetch = 0 : i64, scratch_operands = 0 : i64, tpu.core_type = #tpu.core_type<tc>, window_params = [{transform_indices = @transform_0, window_bounds = array<i64: 1, 9, 16>}, {pipeline_mode = #tpu.pipeline_mode<synchronous>, transform_indices = @transform_1, window_bounds = array<i64: 3, 16, 1>}, {pipeline_mode = #tpu.pipeline_mode<synchronous>, transform_indices = @transform_2, window_bounds = array<i64: 1, 1>}, {transform_indices = @transform_3, window_bounds = array<i64: 1, 8, 2>}]} {
    %c0 = arith.constant 0 : index
    %c0_0 = arith.constant 0 : index
    %c0_1 = arith.constant 0 : index
    %0 = vector.load %arg1[%c0, %c0_0, %c0_1] : memref<1x9x16xf32, #tpu.memory_space<vmem>>, vector<1x8x16xf32>
    %1 = vector.shape_cast %0 : vector<1x8x16xf32> to vector<8x16xf32>
    %c0_2 = arith.constant 0 : index
    %c1 = arith.constant 1 : index
    %c0_3 = arith.constant 0 : index
    %2 = vector.load %arg1[%c0_2, %c1, %c0_3] : memref<1x9x16xf32, #tpu.memory_space<vmem>>, vector<1x8x16xf32>
    %3 = vector.shape_cast %2 : vector<1x8x16xf32> to vector<8x16xf32>
    %c0_4 = arith.constant 0 : index
    %c0_5 = arith.constant 0 : index
    %c0_6 = arith.constant 0 : index
    %4 = vector.load %arg2[%c0_4, %c0_5, %c0_6] : memref<3x16x1xf32, #tpu.memory_space<vmem>>, vector<1x16x1xf32>
    %5 = vector.shape_cast %4 : vector<1x16x1xf32> to vector<16x1xf32>
    %cst = arith.constant dense<0.000000e+00> : vector<8x1xf32>
    %6 = tpu.matmul %1, %5, %cst {dimension_numbers = #tpu.dot_dimension_numbers<[1], [0], [0], [1], [0, 0, 1, 1], [], []>} : vector<8x16xf32>, vector<16x1xf32>, vector<8x1xf32> -> vector<8x1xf32>
    %c0_7 = arith.constant 0 : index
    %c0_8 = arith.constant 0 : index
    %7 = vector.load %arg3[%c0_7, %c0_8] : memref<1x1xf32, #tpu.memory_space<vmem>>, vector<1x1xf32>
    %8 = vector.broadcast %7 : vector<1x1xf32> to vector<8x1xf32>
    %9 = arith.addf %6, %8 : vector<8x1xf32>
    %c1_9 = arith.constant 1 : index
    %c0_10 = arith.constant 0 : index
    %c0_11 = arith.constant 0 : index
    %10 = vector.load %arg2[%c1_9, %c0_10, %c0_11] : memref<3x16x1xf32, #tpu.memory_space<vmem>>, vector<1x16x1xf32>
    %11 = vector.shape_cast %10 : vector<1x16x1xf32> to vector<16x1xf32>
    %cst_12 = arith.constant dense<0.000000e+00> : vector<8x1xf32>
    %12 = tpu.matmul %1, %11, %cst_12 {dimension_numbers = #tpu.dot_dimension_numbers<[1], [0], [0], [1], [0, 0, 1, 1], [], []>} : vector<8x16xf32>, vector<16x1xf32>, vector<8x1xf32> -> vector<8x1xf32>
    %c2 = arith.constant 2 : index
    %c0_13 = arith.constant 0 : index
    %c0_14 = arith.constant 0 : index
    %13 = vector.load %arg2[%c2, %c0_13, %c0_14] : memref<3x16x1xf32, #tpu.memory_space<vmem>>, vector<1x16x1xf32>
    %14 = vector.shape_cast %13 : vector<1x16x1xf32> to vector<16x1xf32>
    %cst_15 = arith.constant dense<0.000000e+00> : vector<8x1xf32>
    %15 = tpu.matmul %3, %14, %cst_15 {dimension_numbers = #tpu.dot_dimension_numbers<[1], [0], [0], [1], [0, 0, 1, 1], [], []>} : vector<8x16xf32>, vector<16x1xf32>, vector<8x1xf32> -> vector<8x1xf32>
    %16 = arith.addf %12, %15 : vector<8x1xf32>
    %c0_16 = arith.constant 0 : index
    %c0_17 = arith.constant 0 : index
    %17 = vector.load %arg3[%c0_16, %c0_17] : memref<1x1xf32, #tpu.memory_space<vmem>>, vector<1x1xf32>
    %18 = vector.broadcast %17 : vector<1x1xf32> to vector<8x1xf32>
    %19 = arith.addf %16, %18 : vector<8x1xf32>
    %cst_18 = arith.constant 0.000000e+00 : f32
    %20 = vector.broadcast %cst_18 : f32 to vector<8x1xf32>
    %21 = arith.maximumf %9, %20 : vector<8x1xf32>
    %c0_19 = arith.constant 0 : index
    %c0_20 = arith.constant 0 : index
    %c0_21 = arith.constant 0 : index
    %22 = vector.load %arg4[%c0_19, %c0_20, %c0_21] : memref<1x8x2xf32, #tpu.memory_space<vmem>>, vector<1x8x1xf32>
    %23 = vector.shape_cast %22 : vector<1x8x1xf32> to vector<8x1xf32>
    %24 = vector.shape_cast %21 : vector<8x1xf32> to vector<1x8x1xf32>
    tpu.vector_store %arg4[%c0_19, %c0_20, %c0_21], %24 {strides = array<i32>} : memref<1x8x2xf32, #tpu.memory_space<vmem>>, vector<1x8x1xf32>,
    %cst_22 = arith.constant 0.000000e+00 : f32
    %25 = vector.broadcast %cst_22 : f32 to vector<8x1xf32>
    %26 = arith.maximumf %19, %25 : vector<8x1xf32>
    %c0_23 = arith.constant 0 : index
    %c0_24 = arith.constant 0 : index
    %c1_25 = arith.constant 1 : index
    %27 = vector.load %arg4[%c0_23, %c0_24, %c1_25] : memref<1x8x2xf32, #tpu.memory_space<vmem>>, vector<1x8x1xf32>
    %28 = vector.shape_cast %27 : vector<1x8x1xf32> to vector<8x1xf32>
    %29 = vector.shape_cast %26 : vector<8x1xf32> to vector<1x8x1xf32>
    tpu.vector_store %arg4[%c0_23, %c0_24, %c1_25], %29 {strides = array<i32>} : memref<1x8x2xf32, #tpu.memory_space<vmem>>, vector<1x8x1xf32>,
    return
  }
  func.func @transform_0(%arg0: i32) -> (i32, i32, i32) {
    %c0_i32 = arith.constant 0 : i32
    %c0_i32_0 = arith.constant 0 : i32
    %c0_i32_1 = arith.constant 0 : i32
    return %arg0, %c0_i32, %c0_i32_0 : i32, i32, i32
  }
  func.func @transform_1(%arg0: i32) -> (i32, i32, i32) {
    %c0_i32 = arith.constant 0 : i32
    %c0_i32_0 = arith.constant 0 : i32
    %c0_i32_1 = arith.constant 0 : i32
    %c0_i32_2 = arith.constant 0 : i32
    return %c0_i32, %c0_i32_0, %c0_i32_1 : i32, i32, i32
  }
  func.func @transform_2(%arg0: i32) -> (i32, i32) {
    %c0_i32 = arith.constant 0 : i32
    %c0_i32_0 = arith.constant 0 : i32
    %c0_i32_1 = arith.constant 0 : i32
    return %c0_i32, %c0_i32_0 : i32, i32
  }
  func.func @transform_3(%arg0: i32) -> (i32, i32, i32) {
    %c0_i32 = arith.constant 0 : i32
    %c0_i32_0 = arith.constant 0 : i32
    %c0_i32_1 = arith.constant 0 : i32
    return %arg0, %c0_i32, %c0_i32_0 : i32, i32, i32
  }
}

</mosaic_0001>

<bundles_post_ra>
// kernel: cnn_ae_v2_forward.6
= control target key start
LH: loop header
LB: loop body
LE: loop exit
PB: predicated region body
PF: predicated region fallthrough
CT: control target
= control target key end

     0   :  { %s615_s15 = smov 0   ;;  %s657_s0 = inlined_call_operand.vmem [shape: f32[2,9,1], index: 0, kind: input, shape index: {}]   ;;  %s658_s1 = inlined_call_operand.vmem [shape: f32[2,8,1], index: 1, kind: input, shape index: {}]   ;;  %s659_s2 = inlined_call_operand.vmem [shape: f32[3,1,16], index: 2, kind: input, shape index: {}]   ;;  %s660_s3 = inlined_call_operand.vmem [shape: f32[1,16], index: 3, kind: input, shape index: {}]   ;;  %s661_s4 = inlined_call_operand.vmem [shape: f32[2,8,16], index: 4, kind: output, shape index: {}]  }
   0x1 LB: > { %s528_s16 = sadd.s32 4294967295, %s586_s15   ;;  %p532_p0 = scmp.ge.s32.totalorder %s586_s15, 1  ;;  %s586_s15 = sphi %s615_s15, %s14_s15  }
   0x2   : > { %p171_p1 = scmp.lt.s32.totalorder %s586_s15, 3 }
   0x4   : > { %p172_p2 = pnand %p532_p0, %p171_p1 }
   0x5   : > { %v537_v0 = vld [vmem:[%s659_s2 + $0x1] sm:$0x1] (!%p172_p2)  ;;  %vm222_vm0 = vcmask (!%p172_p2), 1040384   ;;  %p200_p3 = scmp.lt.s32.totalorder (!%p172_p2), %s528_s16, 1  ;;  %v588_v1 = vmov (!%p172_p2), 0.0   ;;  %vm589_vm1 = vmmov (!%p172_p2), 0  }
   0x6   : > { %175 = sbr.rel (%p172_p2) target bundleno = 240 (0xf0), region = 36  ;;  %555 = vmatprep.subr.mxu0 (!%p172_p2), %v588_v1  ;;  %560 = vmatprep.subr.mxu1 (!%p172_p2), %v588_v1  ;;  %v214_v2 = vld [vmem:[%s659_s2] sm:$0x1] (!%p172_p2)  ;;  %vm218_vm2 = vcmask (!%p172_p2), 7168   ;;  %v542_v3 = vld [vmem:[%s659_s2 + $0x2] sm:$0x1] (!%p172_p2) }
   0x7   : > { %556 = vmatpush3.msk.msra.mxu0 (!%p172_p2), %vm222_vm0, %v537_v0  ;;  %557 = vmatprep.mubr.msk.f32.mxu0 (!%p172_p2), %vm589_vm1, %v588_v1  ;;  %v545_v13 = vld [vmem:[%s660_s3] ss:$0 sm:$0xff] (!%p172_p2)  ;;  %vm461_vm3 = vcmask (!%p172_p2), 130048  }
   0x8   : > { %561 = vmatpush3.msk.msra.mxu1 (!%p172_p2), %vm222_vm0, %v214_v2  ;;  %562 = vmatprep.mubr.msk.f32.mxu1 (!%p172_p2), %vm589_vm1, %v588_v1 }
   0x9   : > { %565 = vmatprep.subr.mxu0 (!%p172_p2), %v588_v1 }
   0xd   : > { %s663_s16 = smov (!%p200_p3, %s528_s16), 1 }
   0xe   : > { %s535_s21 = sshll.u32 %s663_s16, 3  ;;  %s548_s22 = sshll.u32 %s663_s16, 4 }
   0xf   : > { %s208_s25 = scalar_lea.vmem %s658_s1, %s535_s21  ;;  %s204_s30 = scalar_lea.vmem %s657_s0, %s548_s22 }
  0x10   : > { %v215_v4 = vld [vmem:[%s208_s25] sm:$0xff]  ;;  %s212_s9 = scalar_lea.vmem %s661_s4, %s535_s21 }
  0x11   : > { %558 = vmatmul.mubr.msk.f32.vlgmr.msra.gmra.mrb[0].mxu0 %vm218_vm2, %v215_v4  ;;  %v213_v5 = vld [vmem:[%s204_s30] sm:$0xff] }
  0x12   : > { %563 = vmatmul.mubr.msk.f32.vlgmr.msra.gmra.mrb[0].mxu1 %vm218_vm2, %v213_v5  ;;  %v372_v6 = vld [vmem:[%s204_s30 + $0x1] sm:$0xff]  ;;  %566 = vmatpush3.msk.msra.mxu0 %vm222_vm0, %v542_v3 }
  0x13   : > { %567 = vmatprep.mubr.msk.f32.mxu0 %vm589_vm1, %v588_v1 }
  0x15   : > { %568 = vmatmul.mubr.msk.f32.vlgmr.msra.gmra.mrb[2].mxu0 %vm218_vm2, %v372_v6 }
  0xe4   : > { %v292_v7 = vpop.f32.mrb[0].mxu0 }
  0xe5   : > { %v368_v8 = vpop.f32.mrb[0].mxu1  ;;  %v559_v9 = vpop.f32.mrb[1].mxu0 }
  0xe6   : > { %v369_v10 = vadd.f32 %v368_v8, %v292_v7  ;;  %v564_v11 = vpop.f32.mrb[1].mxu1 }
  0xe8   : > { %v447_v12 = vpop.f32.mrb[2].mxu0 }
  0xe9   : > { %v451_v14 = vadd.f32 %v447_v12, %v369_v10  ;;  %v569_v15 = vpop.f32.mrb[3].mxu0 }
  0xeb   : > { %v459_v16 = vadd.f32 %v545_v13, %v451_v14 }
  0xed   : > { %v460_v17 = vmax.f32 %v459_v16, 0.0 }
  0xef   : > { %462 = vst.msk [vmem:[%s212_s9] sm:$0xff] %vm461_vm3, %v460_v17 }
  0xf0 PF: > { %s14_s15 = sadd.s32 1, %s586_s15  }
  0xf1   : > { %p11_p4 = scmp.ge.s32.totalorder %s14_s15, 4  }
  0xf3   :  { %13 = sbr.rel (!%p11_p4) target bundleno = 1 (0x1), region = 71 }

// kernel: cnn_ae_v2_forward.7
= control target key start
LH: loop header
LB: loop body
LE: loop exit
PB: predicated region body
PF: predicated region fallthrough
CT: control target
= control target key end

     0   :  { %s622_s15 = smov 0   ;;  %s666_s0 = inlined_call_operand.vmem [shape: f32[2,5,16], index: 0, kind: input, shape index: {}]   ;;  %s667_s1 = inlined_call_operand.vmem [shape: f32[2,4,16], index: 1, kind: input, shape index: {}]   ;;  %s668_s2 = inlined_call_operand.vmem [shape: f32[3,16,32], index: 2, kind: input, shape index: {}]   ;;  %s669_s3 = inlined_call_operand.vmem [shape: f32[1,32], index: 3, kind: input, shape index: {}]   ;;  %s670_s4 = inlined_call_operand.vmem [shape: f32[2,4,32], index: 4, kind: output, shape index: {}]  }
   0x1 LB: > { %s518_s16 = sadd.s32 4294967295, %s592_s15   ;;  %p522_p0 = scmp.ge.s32.totalorder %s592_s15, 1  ;;  %s592_s15 = sphi %s622_s15, %s14_s15  }
   0x2   : > { %p170_p1 = scmp.lt.s32.totalorder %s592_s15, 3 }
   0x4   : > { %p171_p2 = pnand %p522_p0, %p170_p1 }
   0x5   : > { %v526_v0 = vld [vmem:[%s668_s2 + $0x10] sm:$0xff] (!%p171_p2)  ;;  %v527_v1 = vld [vmem:[%s668_s2 + $0x18] sm:$0xff] (!%p171_p2)  ;;  %v211_v2 = vld [vmem:[%s668_s2] sm:$0xff] (!%p171_p2)  ;;  %v594_v3 = vmov (!%p171_p2), 0.0|0.0   ;;  %p198_p3 = scmp.lt.s32.totalorder (!%p171_p2), %s518_s16, 1  ;;  %vm595_vm0 = vmmov (!%p171_p2), 0  }
   0x6   : > { %174 = sbr.rel (%p171_p2) target bundleno = 240 (0xf0), region = 36  ;;  %566 = vmatprep.subr.bf16.mxu0 (!%p171_p2), %v594_v3  ;;  %v567_v4 = vpack.c.bf16 (!%p171_p2), %v527_v1, %v526_v0  ;;  %569 = vmatprep.subr.bf16.mxu1 (!%p171_p2), %v594_v3  ;;  %v212_v5 = vld [vmem:[%s668_s2 + $0x8] sm:$0xff] (!%p171_p2)  ;;  %v596_v7 = vmov (!%p171_p2), 0.0   ;;  %v530_v8 = vld [vmem:[%s668_s2 + $0x20] sm:$0xff] (!%p171_p2)  ;;  %vm217_vm1 = vcmask (!%p171_p2), 130048   ;;  %vm451_vm2 = vcmask (!%p171_p2), 257024  }
   0x7   : > { %v570_v6 = vpack.c.bf16 (!%p171_p2), %v212_v5, %v211_v2  ;;  %549 = vmatprep.mubr.msk.f32.mxu0 (!%p171_p2), %vm595_vm0, %v596_v7  ;;  %556 = vmatprep.mubr.msk.f32.mxu1 (!%p171_p2), %vm595_vm0, %v596_v7  ;;  %v531_v9 = vld [vmem:[%s668_s2 + $0x28] sm:$0xff] (!%p171_p2)  ;;  %v533_v20 = vld [vmem:[%s669_s3] ss:$0 sm:$0xff] (!%p171_p2) }
   0x8   : > { %568 = vmatpush3.bf16.msra.mxu0 (!%p171_p2), %v567_v4  ;;  %v573_v10 = vpack.c.bf16 (!%p171_p2), %v531_v9, %v530_v8 }
   0x9   : > { %571 = vmatpush3.bf16.msra.mxu1 (!%p171_p2), %v570_v6  ;;  %572 = vmatprep.subr.bf16.mxu0 (!%p171_p2), %v594_v3 }
   0xd   : > { %s672_s16 = smov (!%p198_p3, %s518_s16), 1 }
   0xe   : > { %s524_s29 = sshll.u32 %s672_s16, 2  ;;  %s523_s30 = sshll.u32 %s672_s16, 3 }
   0xf   : > { %s205_s7 = scalar_lea.vmem %s667_s1, %s524_s29  ;;  %s201_s10 = scalar_lea.vmem %s666_s0, %s523_s30 }
  0x10   : > { %v213_v11 = vld [vmem:[%s205_s7] sm:$0xf]  ;;  %s209_s16 = scalar_lea.vmem %s670_s4, %s524_s29 }
  0x11   : > { %550 = vmatmul.mubr.msk.f32.vlgmr.msra.gmra.mrb[0].mxu0 %vm217_vm1, %v213_v11  ;;  %v210_v12 = vld [vmem:[%s201_s10] sm:$0xf] }
  0x12   : > { %557 = vmatmul.mubr.msk.f32.vlgmr.msra.gmra.mrb[0].mxu1 %vm217_vm1, %v210_v12  ;;  %v364_v13 = vld [vmem:[%s201_s10 + $0x1] sm:$0xf]  ;;  %574 = vmatpush3.bf16.msra.mxu0 %v573_v10 }
  0x13   : > { %563 = vmatprep.mubr.msk.f32.mxu0 %vm595_vm0, %v596_v7 }
  0x15   : > { %564 = vmatmul.mubr.msk.f32.vlgmr.msra.gmra.mrb[2].mxu0 %vm217_vm1, %v364_v13 }
  0xe4   : > { %v287_v14 = vpop.f32.mrb[0].mxu0 }
  0xe5   : > { %v360_v15 = vpop.f32.mrb[0].mxu1  ;;  %v551_v16 = vpop.f32.mrb[1].mxu0 }
  0xe6   : > { %v361_v17 = vadd.f32 %v360_v15, %v287_v14  ;;  %v558_v18 = vpop.f32.mrb[1].mxu1 }
  0xe8   : > { %v437_v19 = vpop.f32.mrb[2].mxu0 }
  0xe9   : > { %v441_v21 = vadd.f32 %v437_v19, %v361_v17  ;;  %v565_v22 = vpop.f32.mrb[3].mxu0 }
  0xeb   : > { %v449_v23 = vadd.f32 %v533_v20, %v441_v21 }
  0xed   : > { %v450_v24 = vmax.f32 %v449_v23, 0.0 }
  0xef   : > { %452 = vst.msk [vmem:[%s209_s16] sm:$0xf] %vm451_vm2, %v450_v24 }
  0xf0 PF: > { %s14_s15 = sadd.s32 1, %s592_s15  }
  0xf1   : > { %p11_p4 = scmp.ge.s32.totalorder %s14_s15, 4  }
  0xf3   :  { %13 = sbr.rel (!%p11_p4) target bundleno = 1 (0x1), region = 71 }

// kernel: cnn_ae_v2_forward.8
= control target key start
LH: loop header
LB: loop body
LE: loop exit
PB: predicated region body
PF: predicated region fallthrough
CT: control target
= control target key end

     0   :  { %s659_s15 = smov 0   ;;  %s732_s0 = inlined_call_operand.vmem [shape: f32[2,3,32], index: 0, kind: input, shape index: {}]   ;;  %s733_s1 = inlined_call_operand.vmem [shape: f32[2,2,32], index: 1, kind: input, shape index: {}]   ;;  %s734_s2 = inlined_call_operand.vmem [shape: f32[3,32,64], index: 2, kind: input, shape index: {}]   ;;  %s735_s3 = inlined_call_operand.vmem [shape: f32[1,64], index: 3, kind: input, shape index: {}]   ;;  %s736_s4 = inlined_call_operand.vmem [shape: f32[2,2,64], index: 4, kind: output, shape index: {}]  }
   0x1 LB: > { %s524_s16 = sadd.s32 4294967295, %s629_s15   ;;  %p528_p0 = scmp.ge.s32.totalorder %s629_s15, 1  ;;  %s629_s15 = sphi %s659_s15, %s14_s15  }
   0x2   : > { %p170_p1 = scmp.lt.s32.totalorder %s629_s15, 3 }
   0x4   : > { %p171_p2 = pnand %p528_p0, %p170_p1 }
   0x5   : > { %v532_v0 = vld [vmem:[%s734_s2 + $0x20] sm:$0xff] (!%p171_p2)  ;;  %v533_v1 = vld [vmem:[%s734_s2 + $0x28] sm:$0xff] (!%p171_p2)  ;;  %v631_v3 = vmov (!%p171_p2), 0.0|0.0   ;;  %v534_v6 = vld [vmem:[%s734_s2 + $0x30] sm:$0xff] (!%p171_p2)  ;;  %p198_p3 = scmp.lt.s32.totalorder (!%p171_p2), %s524_s16, 1  ;;  %vm632_vm0 = vmmov (!%p171_p2), 0  }
   0x6   : > { %174 = sbr.rel (%p171_p2) target bundleno = 244 (0xf4), region = 36  ;;  %v211_v2 = vld [vmem:[%s734_s2] sm:$0xff] (!%p171_p2)  ;;  %594 = vmatprep.subr.bf16.mxu0 (!%p171_p2), %v631_v3  ;;  %v595_v4 = vpack.c.bf16 (!%p171_p2), %v533_v1, %v532_v0  ;;  %600 = vmatprep.subr.bf16.mxu1 (!%p171_p2), %v631_v3  ;;  %v212_v5 = vld [vmem:[%s734_s2 + $0x8] sm:$0xff] (!%p171_p2)  ;;  %v535_v7 = vld [vmem:[%s734_s2 + $0x38] sm:$0xff] (!%p171_p2)  ;;  %v633_v11 = vmov (!%p171_p2), 0.0   ;;  %vm221_vm1 = vcmask (!%p171_p2), 261120  }
   0x7   : > { %v601_v8 = vpack.c.bf16 (!%p171_p2), %v212_v5, %v211_v2  ;;  %v213_v9 = vld [vmem:[%s734_s2 + $0x10] sm:$0xff] (!%p171_p2)  ;;  %v214_v10 = vld [vmem:[%s734_s2 + $0x18] sm:$0xff] (!%p171_p2)  ;;  %569 = vmatprep.mubr.msk.f32.mxu0 (!%p171_p2), %vm632_vm0, %v633_v11  ;;  %580 = vmatprep.mubr.msk.f32.mxu1 (!%p171_p2), %vm632_vm0, %v633_v11  ;;  %v598_v12 = vpack.c.bf16 (!%p171_p2), %v535_v7, %v534_v6  ;;  %v538_v14 = vld [vmem:[%s734_s2 + $0x40] sm:$0xff] (!%p171_p2)  ;;  %vm457_vm2 = vcmask (!%p171_p2), 517120  }
   0x8   : > { %596 = vmatpush3.bf16.msra.mxu0 (!%p171_p2), %v595_v4  ;;  %v604_v13 = vpack.c.bf16 (!%p171_p2), %v214_v10, %v213_v9  ;;  %v539_v15 = vld [vmem:[%s734_s2 + $0x48] sm:$0xff] (!%p171_p2)  ;;  %v540_v19 = vld [vmem:[%s734_s2 + $0x50] sm:$0xff] (!%p171_p2)  ;;  %v541_v20 = vld [vmem:[%s734_s2 + $0x58] sm:$0xff] (!%p171_p2) }
   0x9   : > { %602 = vmatpush3.bf16.msra.mxu1 (!%p171_p2), %v601_v8  ;;  %597 = vmatprep.subr.bf16.mxu0 (!%p171_p2), %v631_v3  ;;  %v607_v17 = vpack.c.bf16 (!%p171_p2), %v539_v15, %v538_v14  ;;  %v610_v21 = vpack.c.bf16 (!%p171_p2), %v541_v20, %v540_v19  ;;  %v543_v29 = vld [vmem:[%s735_s3] ss:$0 sm:$0xff] (!%p171_p2) }
   0xa   : > { %603 = vmatprep.subr.bf16.mxu1 (!%p171_p2), %v631_v3 }
   0xc   : > { %599 = vmatpush3.bf16.msra.mxu0 (!%p171_p2), %v598_v12 }
   0xd   : > { %s738_s16 = smov (!%p198_p3, %s524_s16), 1  ;;  %605 = vmatpush3.bf16.msra.mxu1 %v604_v13  ;;  %606 = vmatprep.subr.bf16.mxu0 %v631_v3 }
   0xe   : > { %s530_s11 = sshll.u32 %s738_s16, 1  ;;  %s529_s12 = sshll.u32 %s738_s16, 2 }
   0xf   : > { %s205_s17 = scalar_lea.vmem %s733_s1, %s530_s11  ;;  %s201_s20 = scalar_lea.vmem %s732_s0, %s529_s12 }
  0x10   : > { %v215_v16 = vld [vmem:[%s205_s17] sm:$0x3]  ;;  %s209_s29 = scalar_lea.vmem %s736_s4, %s530_s11 }
  0x11   : > { %v210_v18 = vld [vmem:[%s201_s20] sm:$0x3]  ;;  %570 = vmatmul.mubr.msk.f32.vlgmr.msra.gmra.mrb[0].mxu0 %vm221_vm1, %v215_v16 }
  0x12   : > { %581 = vmatmul.mubr.msk.f32.vlgmr.msra.gmra.mrb[0].mxu1 %vm221_vm1, %v210_v18  ;;  %608 = vmatpush3.bf16.msra.mxu0 %v607_v17  ;;  %v368_v22 = vld [vmem:[%s201_s20 + $0x1] sm:$0x3] }
  0x13   : > { %609 = vmatprep.subr.bf16.mxu0 %v631_v3  ;;  %591 = vmatprep.mubr.msk.f32.mxu0 %vm632_vm0, %v633_v11 }
  0x16   : > { %611 = vmatpush3.bf16.msra.mxu0 %v610_v21 }
  0x19   : > { %592 = vmatmul.mubr.msk.f32.vlgmr.msra.gmra.mrb[2].mxu0 %vm221_vm1, %v368_v22 }
  0xe4   : > { %v291_v23 = vpop.f32.mrb[0].mxu0 }
  0xe5   : > { %v571_v24 = vpop.f32.mrb[1].mxu0  ;;  %v364_v25 = vpop.f32.mrb[0].mxu1 }
  0xe6   : > { %v365_v26 = vadd.f32 %v364_v25, %v291_v23  ;;  %v582_v27 = vpop.f32.mrb[1].mxu1 }
  0xec   : > { %v443_v28 = vpop.f32.mrb[2].mxu0 }
  0xed   : > { %v447_v30 = vadd.f32 %v443_v28, %v365_v26  ;;  %v593_v31 = vpop.f32.mrb[3].mxu0 }
  0xef   : > { %v455_v32 = vadd.f32 %v543_v29, %v447_v30 }
  0xf1   : > { %v456_v33 = vmax.f32 %v455_v32, 0.0 }
  0xf3   : > { %458 = vst.msk [vmem:[%s209_s29] sm:$0x3] %vm457_vm2, %v456_v33 }
  0xf4 PF: > { %s14_s15 = sadd.s32 1, %s629_s15  }
  0xf5   : > { %p11_p4 = scmp.ge.s32.totalorder %s14_s15, 4  }
  0xf7   :  { %13 = sbr.rel (!%p11_p4) target bundleno = 1 (0x1), region = 71 }

// kernel: cnn_ae_v2_forward.9
= control target key start
LH: loop header
LB: loop body
LE: loop exit
PB: predicated region body
PF: predicated region fallthrough
CT: control target
= control target key end

     0   :  { %s675_s12 = smov 0   ;;  %s789_s0 = inlined_call_operand.vmem [shape: f32[2,3,64], index: 0, kind: input, shape index: {}]   ;;  %s790_s1 = inlined_call_operand.vmem [shape: f32[3,64,32], index: 1, kind: input, shape index: {}]   ;;  %s791_s2 = inlined_call_operand.vmem [shape: f32[1,32], index: 2, kind: input, shape index: {}]   ;;  %s792_s3 = inlined_call_operand.vmem [shape: f32[2,2,64], index: 3, kind: output, shape index: {}]  }
   0x1 LB: > { %s482_s13 = sadd.s32 4294967295, %s649_s12   ;;  %p486_p0 = scmp.ge.s32.totalorder %s649_s12, 1  ;;  %s649_s12 = sphi %s675_s12, %s13_s12  }
   0x2   : > { %p136_p1 = scmp.lt.s32.totalorder %s649_s12, 3 }
   0x4   : > { %p137_p2 = pnand %p486_p0, %p136_p1 }
   0x5   : > { %v168_v0 = vld [vmem:[%s790_s1] sm:$0xff] (!%p137_p2)  ;;  %v169_v1 = vld [vmem:[%s790_s1 + $0x8] sm:$0xff] (!%p137_p2)  ;;  %v170_v2 = vld [vmem:[%s790_s1 + $0x10] sm:$0xff] (!%p137_p2)  ;;  %v651_v3 = vmov (!%p137_p2), 0.0|0.0   ;;  %vm652_vm0 = vmmov (!%p137_p2), 0   ;;  %v653_v6 = vmov (!%p137_p2), 0.0  }
   0x6   : > { %140 = sbr.rel (%p137_p2) target bundleno = 373 (0x175), region = 32  ;;  %595 = vmatprep.subr.bf16.mxu0 (!%p137_p2), %v651_v3  ;;  %v596_v4 = vpack.c.bf16 (!%p137_p2), %v169_v1, %v168_v0  ;;  %v171_v5 = vld [vmem:[%s790_s1 + $0x18] sm:$0xff] (!%p137_p2)  ;;  %554 = vmatprep.mubr.msk.f32.mxu0 (!%p137_p2), %vm652_vm0, %v653_v6  ;;  %p158_p3 = scmp.lt.s32.totalorder (!%p137_p2), %s482_s13, 1  ;;  %v499_v7 = vld [vmem:[%s790_s1 + $0x80] sm:$0xff] (!%p137_p2)  ;;  %v500_v10 = vld [vmem:[%s790_s1 + $0x88] sm:$0xff] (!%p137_p2)  ;;  %vm183_vm1 = vcmask (!%p137_p2), 523264  }
   0x7   : > { %607 = vmatprep.subr.bf16.mxu1 (!%p137_p2), %v651_v3  ;;  %573 = vmatprep.mubr.msk.f32.mxu1 (!%p137_p2), %vm652_vm0, %v653_v6  ;;  %v599_v8 = vpack.c.bf16 (!%p137_p2), %v171_v5, %v170_v2  ;;  %v172_v9 = vld [vmem:[%s790_s1 + $0x20] sm:$0xff] (!%p137_p2)  ;;  %v173_v11 = vld [vmem:[%s790_s1 + $0x28] sm:$0xff] (!%p137_p2)  ;;  %v608_v12 = vpack.c.bf16 (!%p137_p2), %v500_v10, %v499_v7  ;;  %v501_v13 = vld [vmem:[%s790_s1 + $0x90] sm:$0xff] (!%p137_p2)  ;;  %vm420_vm2 = vcmask (!%p137_p2), 254976   ;;  %s654_s22 = smov (!%p137_p2), 32   ;;  %vm427_vm3 = vcmask (!%p137_p2), 517376  }
   0x8   : > { %597 = vmatpush3.bf16.msra.mxu0 (!%p137_p2), %v596_v4  ;;  %v502_v14 = vld [vmem:[%s790_s1 + $0x98] sm:$0xff] (!%p137_p2)  ;;  %v602_v16 = vpack.c.bf16 (!%p137_p2), %v173_v11, %v172_v9  ;;  %v503_v17 = vld [vmem:[%s790_s1 + $0xa0] sm:$0xff] (!%p137_p2)  ;;  %v504_v18 = vld [vmem:[%s790_s1 + $0xa8] sm:$0xff] (!%p137_p2) }
   0x9   : > { %598 = vmatprep.subr.bf16.mxu0 (!%p137_p2), %v651_v3  ;;  %609 = vmatpush3.bf16.msra.mxu1 (!%p137_p2), %v608_v12  ;;  %v611_v15 = vpack.c.bf16 (!%p137_p2), %v502_v14, %v501_v13  ;;  %v174_v19 = vld [vmem:[%s790_s1 + $0x30] sm:$0xff] (!%p137_p2)  ;;  %v175_v20 = vld [vmem:[%s790_s1 + $0x38] sm:$0xff] (!%p137_p2)  ;;  %v614_v21 = vpack.c.bf16 (!%p137_p2), %v504_v18, %v503_v17  ;;  %v491_v25 = vld [vmem:[%s790_s1 + $0x40] sm:$0xff] (!%p137_p2) }
   0xa   : > { %610 = vmatprep.subr.bf16.mxu1 (!%p137_p2), %v651_v3  ;;  %v605_v22 = vpack.c.bf16 (!%p137_p2), %v175_v20, %v174_v19  ;;  %v505_v23 = vld [vmem:[%s790_s1 + $0xb0] sm:$0xff] (!%p137_p2)  ;;  %v506_v24 = vld [vmem:[%s790_s1 + $0xb8] sm:$0xff] (!%p137_p2)  ;;  %v492_v26 = vld [vmem:[%s790_s1 + $0x48] sm:$0xff] (!%p137_p2) }
   0xb   : > { %v617_v27 = vpack.c.bf16 (!%p137_p2), %v506_v24, %v505_v23  ;;  %v620_v29 = vpack.c.bf16 (!%p137_p2), %v492_v26, %v491_v25  ;;  %v493_v30 = vld [vmem:[%s790_s1 + $0x50] sm:$0xff] (!%p137_p2)  ;;  %v494_v31 = vld [vmem:[%s790_s1 + $0x58] sm:$0xff] (!%p137_p2)  ;;  %v495_v34 = vld [vmem:[%s790_s1 + $0x60] sm:$0xff] (!%p137_p2) }
   0xc   : > { %600 = vmatpush3.bf16.msra.mxu0 (!%p137_p2), %v599_v8  ;;  %v623_v33 = vpack.c.bf16 (!%p137_p2), %v494_v31, %v493_v30  ;;  %v496_v35 = vld [vmem:[%s790_s1 + $0x68] sm:$0xff] (!%p137_p2)  ;;  %v497_v37 = vld [vmem:[%s790_s1 + $0x70] sm:$0xff] (!%p137_p2)  ;;  %v498_v38 = vld [vmem:[%s790_s1 + $0x78] sm:$0xff] (!%p137_p2) }
   0xd   : > { %s794_s13 = smov (!%p158_p3, %s482_s13), 1  ;;  %601 = vmatprep.subr.bf16.mxu0 %v651_v3  ;;  %612 = vmatpush3.bf16.msra.mxu1 %v611_v15  ;;  %v626_v36 = vpack.c.bf16 %v496_v35, %v495_v34  ;;  %v629_v39 = vpack.c.bf16 %v498_v38, %v497_v37  ;;  %v489_v40 = vld [vmem:[%s791_s2] ss:$0 sm:$0xff] }
   0xe   : > { %s487_s17 = sshll.u32 %s794_s13, 2  ;;  %613 = vmatprep.subr.bf16.mxu1 %v651_v3  ;;  %s488_s18 = sshll.u32 %s794_s13, 1 }
   0xf   : > { %s161_s24 = scalar_lea.vmem %s789_s0, %s487_s17  ;;  %s165_s21 = scalar_lea.vmem %s792_s3, %s488_s18 }
  0x10   : > { %603 = vmatpush3.bf16.msra.mxu0 %v602_v16  ;;  %v166_v28 = vld [vmem:[%s161_s24] sm:$0x3] }
  0x11   : > { %604 = vmatprep.subr.bf16.mxu0 %v651_v3  ;;  %615 = vmatpush3.bf16.msra.mxu1 %v614_v21  ;;  %v167_v32 = vld [vmem:[%s161_s24 + $0x1] sm:$0x3] }
  0x12   : > { %616 = vmatprep.subr.bf16.mxu1 %v651_v3 }
  0x14   : > { %606 = vmatpush3.bf16.msra.mxu0 %v605_v22 }
  0x15   : > { %619 = vmatprep.subr.bf16.mxu0 %v651_v3  ;;  %618 = vmatpush3.bf16.msra.mxu1 %v617_v27 }
  0x17   : > { %555 = vmatmul.mubr.msk.f32.vlgmr.msra.gmra.mrb[0].mxu0 %vm183_vm1, %v166_v28 }
  0x18   : > { %621 = vmatpush3.bf16.msra.mxu0 %v620_v29  ;;  %592 = vmatprep.mubr.msk.f32.mxu0 %vm652_vm0, %v653_v6 }
  0x19   : > { %622 = vmatprep.subr.bf16.mxu0 %v651_v3  ;;  %574 = vmatmul.mubr.msk.f32.vlgmr.msra.gmra.mrb[0].mxu1 %vm183_vm1, %v167_v32 }
  0x1c   : > { %624 = vmatpush3.bf16.msra.mxu0 %v623_v33 }
  0x1d   : > { %625 = vmatprep.subr.bf16.mxu0 %v651_v3 }
  0x20   : > { %627 = vmatpush3.bf16.msra.mxu0 %v626_v36 }
  0x21   : > { %628 = vmatprep.subr.bf16.mxu0 %v651_v3 }
  0x24   : > { %630 = vmatpush3.bf16.msra.mxu0 %v629_v39 }
  0x27   : > { %593 = vmatmul.mubr.msk.f32.vlgmr.msra.gmra.mrb[2].mxu0 %vm183_vm1, %v166_v28 }
  0xea   : > { %v253_v41 = vpop.f32.mrb[0].mxu0 }
  0xeb   : > { %v254_v42 = vadd.f32 %v489_v40, %v253_v41  ;;  %v556_v43 = vpop.f32.mrb[1].mxu0 }
  0xec   : > { %v344_v45 = vpop.f32.mrb[0].mxu1 }
  0xed   : > { %v419_v44 = vmax.f32 %v254_v42, 0.0  ;;  %v575_v46 = vpop.f32.mrb[1].mxu1 }
  0xef   : > { %421 = vst.msk [vmem:[%s165_s21] sm:$0x3] %vm420_vm2, %v419_v44 }
  0xfa   : > { %v414_v47 = vpop.f32.mrb[2].mxu0 }
  0xfb   : > { %v415_v48 = vadd.f32 %v414_v47, %v344_v45  ;;  %v594_v49 = vpop.f32.mrb[3].mxu0 }
  0xfd   : > { %v418_v50 = vadd.f32 %v489_v40, %v415_v48 }
  0xff   : > { %v422_v51 = vmax.f32 %v418_v50, 0.0 }
 0x101   : > { %424 = vrot.lane.b32.xlu0 %v422_v51, %s654_s22 }
 0x173   : > { %v425_v52 = vpop.permute.xlu0 %424 }
 0x174   : > { %428 = vst.msk [vmem:[%s165_s21] sm:$0x3] %vm427_vm3, %v425_v52 }
 0x175 PF: > { %s13_s12 = sadd.s32 1, %s649_s12  }
 0x176   : > { %p10_p4 = scmp.ge.s32.totalorder %s13_s12, 4  }
 0x178   :  { %12 = sbr.rel (!%p10_p4) target bundleno = 1 (0x1), region = 64 }

// kernel: cnn_ae_v2_forward.10
= control target key start
LH: loop header
LB: loop body
LE: loop exit
PB: predicated region body
PF: predicated region fallthrough
CT: control target
= control target key end

     0   :  { %s601_s12 = smov 0   ;;  %s664_s0 = inlined_call_operand.vmem [shape: f32[2,5,32], index: 0, kind: input, shape index: {}]   ;;  %s665_s1 = inlined_call_operand.vmem [shape: f32[3,32,16], index: 1, kind: input, shape index: {}]   ;;  %s666_s2 = inlined_call_operand.vmem [shape: f32[1,16], index: 2, kind: input, shape index: {}]   ;;  %s667_s3 = inlined_call_operand.vmem [shape: f32[2,4,32], index: 3, kind: output, shape index: {}]  }
   0x1 LB: > { %s470_s13 = sadd.s32 4294967295, %s575_s12   ;;  %p474_p0 = scmp.ge.s32.totalorder %s575_s12, 1  ;;  %s575_s12 = sphi %s601_s12, %s13_s12  }
   0x2   : > { %p136_p1 = scmp.lt.s32.totalorder %s575_s12, 3 }
   0x4   : > { %p137_p2 = pnand %p474_p0, %p136_p1 }
   0x5   : > { %v168_v0 = vld [vmem:[%s665_s1] sm:$0xff] (!%p137_p2)  ;;  %v169_v1 = vld [vmem:[%s665_s1 + $0x8] sm:$0xff] (!%p137_p2)  ;;  %v170_v2 = vld [vmem:[%s665_s1 + $0x10] sm:$0xff] (!%p137_p2)  ;;  %v577_v3 = vmov (!%p137_p2), 0.0|0.0   ;;  %vm578_vm0 = vmmov (!%p137_p2), 0   ;;  %v579_v6 = vmov (!%p137_p2), 0.0  }
   0x6   : > { %140 = sbr.rel (%p137_p2) target bundleno = 359 (0x167), region = 32  ;;  %539 = vmatprep.subr.bf16.mxu0 (!%p137_p2), %v577_v3  ;;  %v540_v4 = vpack.c.bf16 (!%p137_p2), %v169_v1, %v168_v0  ;;  %v171_v5 = vld [vmem:[%s665_s1 + $0x18] sm:$0xff] (!%p137_p2)  ;;  %514 = vmatprep.mubr.msk.f32.mxu0 (!%p137_p2), %vm578_vm0, %v579_v6  ;;  %p158_p3 = scmp.lt.s32.totalorder (!%p137_p2), %s470_s13, 1  ;;  %v483_v7 = vld [vmem:[%s665_s1 + $0x40] sm:$0xff] (!%p137_p2)  ;;  %v484_v8 = vld [vmem:[%s665_s1 + $0x48] sm:$0xff] (!%p137_p2)  ;;  %vm179_vm1 = vcmask (!%p137_p2), 261120  }
   0x7   : > { %545 = vmatprep.subr.bf16.mxu1 (!%p137_p2), %v577_v3  ;;  %v546_v9 = vpack.c.bf16 (!%p137_p2), %v484_v8, %v483_v7  ;;  %v485_v10 = vld [vmem:[%s665_s1 + $0x50] sm:$0xff] (!%p137_p2)  ;;  %525 = vmatprep.mubr.msk.f32.mxu1 (!%p137_p2), %vm578_vm0, %v579_v6  ;;  %v543_v11 = vpack.c.bf16 (!%p137_p2), %v171_v5, %v170_v2  ;;  %v486_v12 = vld [vmem:[%s665_s1 + $0x58] sm:$0xff] (!%p137_p2)  ;;  %v479_v13 = vld [vmem:[%s665_s1 + $0x20] sm:$0xff] (!%p137_p2)  ;;  %vm408_vm2 = vcmask (!%p137_p2), 125952   ;;  %s580_s23 = smov (!%p137_p2), 16   ;;  %vm415_vm3 = vcmask (!%p137_p2), 257152  }
   0x8   : > { %541 = vmatpush3.bf16.msra.mxu0 (!%p137_p2), %v540_v4  ;;  %v480_v14 = vld [vmem:[%s665_s1 + $0x28] sm:$0xff] (!%p137_p2)  ;;  %v549_v15 = vpack.c.bf16 (!%p137_p2), %v486_v12, %v485_v10  ;;  %v481_v18 = vld [vmem:[%s665_s1 + $0x30] sm:$0xff] (!%p137_p2)  ;;  %v482_v19 = vld [vmem:[%s665_s1 + $0x38] sm:$0xff] (!%p137_p2) }
   0x9   : > { %542 = vmatprep.subr.bf16.mxu0 (!%p137_p2), %v577_v3  ;;  %547 = vmatpush3.bf16.msra.mxu1 (!%p137_p2), %v546_v9  ;;  %v552_v17 = vpack.c.bf16 (!%p137_p2), %v480_v14, %v479_v13  ;;  %v555_v21 = vpack.c.bf16 (!%p137_p2), %v482_v19, %v481_v18  ;;  %v477_v22 = vld [vmem:[%s666_s2] ss:$0 sm:$0xff] (!%p137_p2) }
   0xa   : > { %548 = vmatprep.subr.bf16.mxu1 (!%p137_p2), %v577_v3 }
   0xc   : > { %544 = vmatpush3.bf16.msra.mxu0 (!%p137_p2), %v543_v11 }
   0xd   : > { %s669_s13 = smov (!%p158_p3, %s470_s13), 1  ;;  %551 = vmatprep.subr.bf16.mxu0 %v577_v3  ;;  %550 = vmatpush3.bf16.msra.mxu1 %v549_v15 }
   0xe   : > { %s475_s7 = sshll.u32 %s669_s13, 3  ;;  %s476_s19 = sshll.u32 %s669_s13, 2 }
   0xf   : > { %s161_s10 = scalar_lea.vmem %s664_s0, %s475_s7  ;;  %s165_s22 = scalar_lea.vmem %s667_s3, %s476_s19 }
  0x10   : > { %v166_v16 = vld [vmem:[%s161_s10] sm:$0xf] }
  0x11   : > { %v167_v20 = vld [vmem:[%s161_s10 + $0x1] sm:$0xf]  ;;  %515 = vmatmul.mubr.msk.f32.vlgmr.msra.gmra.mrb[0].mxu0 %vm179_vm1, %v166_v16 }
  0x12   : > { %553 = vmatpush3.bf16.msra.mxu0 %v552_v17  ;;  %526 = vmatmul.mubr.msk.f32.vlgmr.msra.gmra.mrb[0].mxu1 %vm179_vm1, %v167_v20 }
  0x13   : > { %554 = vmatprep.subr.bf16.mxu0 %v577_v3  ;;  %536 = vmatprep.mubr.msk.f32.mxu0 %vm578_vm0, %v579_v6 }
  0x16   : > { %556 = vmatpush3.bf16.msra.mxu0 %v555_v21 }
  0x19   : > { %537 = vmatmul.mubr.msk.f32.vlgmr.msra.gmra.mrb[2].mxu0 %vm179_vm1, %v166_v16 }
  0xe4   : > { %v249_v23 = vpop.f32.mrb[0].mxu0 }
  0xe5   : > { %v250_v24 = vadd.f32 %v477_v22, %v249_v23  ;;  %v516_v25 = vpop.f32.mrb[1].mxu0  ;;  %v332_v26 = vpop.f32.mrb[0].mxu1 }
  0xe6   : > { %v527_v27 = vpop.f32.mrb[1].mxu1 }
  0xe7   : > { %v407_v28 = vmax.f32 %v250_v24, 0.0 }
  0xe9   : > { %409 = vst.msk [vmem:[%s165_s22] sm:$0xf] %vm408_vm2, %v407_v28 }
  0xec   : > { %v402_v29 = vpop.f32.mrb[2].mxu0 }
  0xed   : > { %v403_v30 = vadd.f32 %v402_v29, %v332_v26  ;;  %v538_v31 = vpop.f32.mrb[3].mxu0 }
  0xef   : > { %v406_v32 = vadd.f32 %v477_v22, %v403_v30 }
  0xf1   : > { %v410_v33 = vmax.f32 %v406_v32, 0.0 }
  0xf3   : > { %412 = vrot.lane.b32.xlu0 %v410_v33, %s580_s23 }
 0x165   : > { %v413_v34 = vpop.permute.xlu0 %412 }
 0x166   : > { %416 = vst.msk [vmem:[%s165_s22] sm:$0xf] %vm415_vm3, %v413_v34 }
 0x167 PF: > { %s13_s12 = sadd.s32 1, %s575_s12  }
 0x168   : > { %p10_p4 = scmp.ge.s32.totalorder %s13_s12, 4  }
 0x16a   :  { %12 = sbr.rel (!%p10_p4) target bundleno = 1 (0x1), region = 64 }

// kernel: cnn_ae_v2_forward.11
= control target key start
LH: loop header
LB: loop body
LE: loop exit
PB: predicated region body
PF: predicated region fallthrough
CT: control target
= control target key end

     0   :  { %s574_s14 = smov 0   ;;  %s612_s0 = inlined_call_operand.vmem [shape: f32[2,9,16], index: 0, kind: input, shape index: {}]   ;;  %s613_s1 = inlined_call_operand.vmem [shape: f32[3,16,1], index: 1, kind: input, shape index: {}]   ;;  %s614_s2 = inlined_call_operand.<no memory space> [shape: f32[1,1], index: 2, kind: input, shape index: {}]   ;;  %s615_s3 = inlined_call_operand.vmem [shape: f32[2,8,2], index: 3, kind: output, shape index: {}]  }
   0x1   :  { %v8_v0 = vstv %s614_s2 }
   0x2   :  { %9 = vst [vmem:[#allocation2] sm:$0x1] %v8_v0 }
   0x3 LB: > { %s469_s15 = sadd.s32 4294967295, %s545_s14   ;;  %p473_p0 = scmp.ge.s32.totalorder %s545_s14, 1  ;;  %s545_s14 = sphi %s574_s14, %s15_s14  }
   0x4   : > { %p139_p1 = scmp.lt.s32.totalorder %s545_s14, 3 }
   0x6   : > { %p140_p2 = pnand %p473_p0, %p139_p1 }
   0x7   : > { %v173_v1 = vld [vmem:[%s613_s1] sm:$0xff] (!%p140_p2)  ;;  %v174_v2 = vld [vmem:[%s613_s1 + $0x8] sm:$0xff] (!%p140_p2)  ;;  %p162_p3 = scmp.lt.s32.totalorder (!%p140_p2), %s469_s15, 1  ;;  %v547_v3 = vmov (!%p140_p2), 0.0|0.0   ;;  %vm548_vm0 = vmmov (!%p140_p2), 0   ;;  %v549_v5 = vmov (!%p140_p2), 0.0  }
   0x8   : > { %143 = sbr.rel (%p140_p2) target bundleno = 357 (0x165), region = 32  ;;  %518 = vmatprep.subr.bf16.mxu0 (!%p140_p2), %v547_v3  ;;  %v519_v4 = vpack.c.bf16 (!%p140_p2), %v174_v2, %v173_v1  ;;  %501 = vmatprep.mubr.msk.f32.mxu0 (!%p140_p2), %vm548_vm0, %v549_v5  ;;  %v481_v6 = vld [vmem:[%s613_s1 + $0x20] sm:$0xff] (!%p140_p2)  ;;  %v482_v7 = vld [vmem:[%s613_s1 + $0x28] sm:$0xff] (!%p140_p2)  ;;  %v479_v8 = vld [vmem:[%s613_s1 + $0x10] sm:$0xff] (!%p140_p2)  ;;  %vm182_vm1 = vcmask (!%p140_p2), 130048   ;;  %vm407_vm2 = vcmask (!%p140_p2), 7168  }
   0x9   : > { %521 = vmatprep.subr.bf16.mxu1 (!%p140_p2), %v547_v3  ;;  %v522_v9 = vpack.c.bf16 (!%p140_p2), %v482_v7, %v481_v6  ;;  %v480_v10 = vld [vmem:[%s613_s1 + $0x18] sm:$0xff] (!%p140_p2)  ;;  %508 = vmatprep.mubr.msk.f32.mxu1 (!%p140_p2), %vm548_vm0, %v549_v5  ;;  %v477_v14 = vld [vmem:[#allocation2] ss:$0 sm:$0xff] (!%p140_p2)  ;;  %s550_s8 = smov (!%p140_p2), 1   ;;  %vm414_vm3 = vcmask (!%p140_p2), 15368  }
   0xa   : > { %520 = vmatpush3.bf16.msra.mxu0 (!%p140_p2), %v519_v4  ;;  %v525_v11 = vpack.c.bf16 (!%p140_p2), %v480_v10, %v479_v8 }
   0xb   : > { %524 = vmatprep.subr.bf16.mxu0 (!%p140_p2), %v547_v3  ;;  %523 = vmatpush3.bf16.msra.mxu1 (!%p140_p2), %v522_v9 }
   0xf   : > { %s617_s15 = smov (!%p162_p3, %s469_s15), 1 }
  0x10   : > { %s487_s27 = sshll.u32 %s617_s15, 4  ;;  %s476_s4 = sshll.u32 %s617_s15, 3 }
  0x11   : > { %s166_s30 = scalar_lea.vmem %s612_s0, %s487_s27  ;;  %s170_s7 = scalar_lea.vmem %s615_s3, %s476_s4 }
  0x12   : > { %v171_v12 = vld [vmem:[%s166_s30] sm:$0xff] }
  0x13   : > { %v172_v13 = vld [vmem:[%s166_s30 + $0x1] sm:$0xff]  ;;  %502 = vmatmul.mubr.msk.f32.vlgmr.msra.gmra.mrb[0].mxu0 %vm182_vm1, %v171_v12 }
  0x14   : > { %509 = vmatmul.mubr.msk.f32.vlgmr.msra.gmra.mrb[0].mxu1 %vm182_vm1, %v172_v13  ;;  %526 = vmatpush3.bf16.msra.mxu0 %v525_v11 }
  0x15   : > { %515 = vmatprep.mubr.msk.f32.mxu0 %vm548_vm0, %v549_v5 }
  0x17   : > { %516 = vmatmul.mubr.msk.f32.vlgmr.msra.gmra.mrb[2].mxu0 %vm182_vm1, %v171_v12 }
  0xe6   : > { %v252_v15 = vpop.f32.mrb[0].mxu0 }
  0xe7   : > { %v331_v16 = vpop.f32.mrb[0].mxu1  ;;  %v253_v17 = vadd.f32 %v477_v14, %v252_v15  ;;  %v503_v18 = vpop.f32.mrb[1].mxu0 }
  0xe8   : > { %v510_v19 = vpop.f32.mrb[1].mxu1 }
  0xe9   : > { %v406_v20 = vmax.f32 %v253_v17, 0.0 }
  0xea   : > { %v401_v21 = vpop.f32.mrb[2].mxu0 }
  0xeb   : > { %408 = vst.msk [vmem:[%s170_s7] sm:$0xff] %vm407_vm2, %v406_v20  ;;  %v402_v22 = vadd.f32 %v401_v21, %v331_v16  ;;  %v517_v23 = vpop.f32.mrb[3].mxu0 }
  0xed   : > { %v405_v24 = vadd.f32 %v477_v14, %v402_v22 }
  0xef   : > { %v409_v25 = vmax.f32 %v405_v24, 0.0 }
  0xf1   : > { %411 = vrot.lane.b32.xlu0 %v409_v25, %s550_s8 }
 0x163   : > { %v412_v26 = vpop.permute.xlu0 %411 }
 0x164   : > { %415 = vst.msk [vmem:[%s170_s7] sm:$0xff] %vm414_vm3, %v412_v26 }
 0x165 PF: > { %s15_s14 = sadd.s32 1, %s545_s14  }
 0x166   : > { %p12_p4 = scmp.ge.s32.totalorder %s15_s14, 4  }
 0x168   :  { %14 = sbr.rel (!%p12_p4) target bundleno = 3 (0x3), region = 64 }

</bundles_post_ra>
